<compile_context>
chip_gen: v6e
topology: v6e:2x2x1
jax: 0.10.0
libtpu: 0.0.40
codegen_flags: <defaults>
</compile_context>

<pallas_src>
import functools
import math

import jax
import jax.numpy as jnp
from jax.experimental import pallas as pl
from jax.experimental.pallas import tpu as pltpu


_APPROX_RECIP = True   # flip to False for exact reciprocals (tighter tolerances)


# ----------------------------- weight-slab layout -----------------------------
def _slab_layout(E, F):
    """Row offsets of every weight/bias inside the single packed f32 slab.

    Each entry starts at an 8-aligned row and column 0, so in-kernel static
    slices are cheap sub-views (no lane shifts / sublane misalignment).
    """
    layout = {}
    r = 0

    def add(name, rows, cols):
        nonlocal r
        layout[name] = (r, rows, cols)
        r += -(-rows // 8) * 8          # round rows up to a multiple of 8

    for pfx in ("sa", "ca"):
        for w in ("wq", "wk", "wv", "wo"):
            add(f"{pfx}_{w}", E, E)
        for b in ("bq", "bk", "bv", "bo"):
            add(f"{pfx}_{b}", 1, E)
    add("ff_w1", E, F)
    add("ff_b1", 1, F)
    add("ff_w2", F, E)
    add("ff_b2", 1, E)
    return layout, r


# --------------------------- fused decoder-layer kernel -----------------------
def _decoder_layer_kernel(x_ref, enc_ref, mask_ref, norm_ref, w_ref, o_ref,
                          *, num_heads, ff_dim, eps):
    BS, E = x_ref.shape
    H = num_heads
    d = E // H
    scale = 1.0 / math.sqrt(d)
    layout, _ = _slab_layout(E, ff_dim)

    def W(name):
        r0, rows, cols = layout[name]
        return w_ref[r0:r0 + rows, 0:cols]          # static sub-view load

    x = x_ref[...].astype(jnp.float32)              # (B*S, E)      batch folded
    enc = enc_ref[...].astype(jnp.float32)          # (B*S_enc, E)  batch folded
    mask_bias = mask_ref[...]                       # (B*S, B*S_k)  additive bias

    def addnorm(z, idx):
        alpha = norm_ref[2 * idx]                   # SMEM scalar reads
        bias = norm_ref[2 * idx + 1]
        n = z.shape[-1]
        mean = jnp.mean(z, axis=-1, keepdims=True)
        # torch.std uses the unbiased estimator (divide by N-1)
        var = jnp.sum((z - mean) ** 2, axis=-1, keepdims=True) * (1.0 / (n - 1))
        inv = pl.reciprocal(jnp.sqrt(var) + eps, approx=_APPROX_RECIP)   # EUP
        return alpha * (z - mean) * inv + bias

    def mha(q_in, kv_in, pfx):
        Sq, Sk = q_in.shape[0], kv_in.shape[0]
        q = jnp.dot(q_in, W(pfx + "_wq"), preferred_element_type=jnp.float32) + W(pfx + "_bq")
        k = jnp.dot(kv_in, W(pfx + "_wk"), preferred_element_type=jnp.float32) + W(pfx + "_bk")
        v = jnp.dot(kv_in, W(pfx + "_wv"), preferred_element_type=jnp.float32) + W(pfx + "_bv")
        # Head split: (S, E) -> (H, S, d); heads become the dot_general batch
        # dim, so all heads' scores / contexts come from one issue each.
        qh = q.reshape(Sq, H, d).transpose(1, 0, 2)
        kh = k.reshape(Sk, H, d).transpose(1, 0, 2)
        vh = v.reshape(Sk, H, d).transpose(1, 0, 2)
        s = jax.lax.dot_general(qh, kh, (((2,), (2,)), ((0,), (0,))),
                                preferred_element_type=jnp.float32) * scale   # (H, Sq, Sk)
        # Additive mask (== masked_fill(-1e9): masked probs underflow to exactly 0)
        s = s + mask_bias[None, :, :]
        s = s - jnp.max(s, axis=-1, keepdims=True)                            # stable softmax
        p = jnp.exp(s)
        p = p * pl.reciprocal(jnp.sum(p, axis=-1, keepdims=True), approx=_APPROX_RECIP)
        # attention dropout is identity (eval mode)
        ctx = jax.lax.dot_general(p, vh, (((2,), (1,)), ((0,), (0,))),
                                  preferred_element_type=jnp.float32)         # (H, Sq, d)
        # Head merge fused into the output projection:
        #   concat_h(ctx_h) @ Wo == sum_h ctx_h @ Wo[h*d:(h+1)*d, :]
        wo3 = W(pfx + "_wo").reshape(H, d, E)        # sublane-split reshape (cheap)
        out = jax.lax.dot_general(ctx, wo3, (((2,), (1,)), ((0,), (0,))),
                                  preferred_element_type=jnp.float32)         # (H, Sq, E)
        return jnp.sum(out, axis=0) + W(pfx + "_bo")

    # residual 0: self-attention (the reference uses srcMask here, not targetMask)
    h0 = addnorm(x, 0)
    x = x + mha(h0, h0, "sa")

    # residual 1: cross-attention with the encoder output (also srcMask)
    h1 = addnorm(x, 1)
    x = x + mha(h1, enc, "ca")

    # residual 2: feed-forward (dropout identity in eval mode)
    h2 = addnorm(x, 2)
    ff = jnp.dot(h2, W("ff_w1"), preferred_element_type=jnp.float32) + W("ff_b1")
    ff = jnp.maximum(ff, 0.0)
    ff = jnp.dot(ff, W("ff_w2"), preferred_element_type=jnp.float32) + W("ff_b2")
    o_ref[...] = (x + ff).astype(o_ref.dtype)


# ------------------------------------ wrapper ----------------------------------
@functools.partial(jax.jit, static_argnums=(5, 6))
def decoder_layer(x, enc_out, src_mask, target_mask, params, num_heads, eps):
    del target_mask                      # never used by the reference forward
    B, S, E = x.shape
    S_enc = enc_out.shape[1]
    S_key = src_mask.shape[-1]
    F = params["ff"]["w1"].shape[1]
    # The reference applies srcMask to both attention blocks, which implicitly
    # requires the encoder length to match the mask key length (== S here).
    assert S_enc == S and S_key == S, "srcMask is reused for both attention blocks"

    BS = B * S
    x2 = x.reshape(BS, E)
    enc2 = enc_out.reshape(B * S_enc, E)

    # Additive attention bias, folded over batch:
    #   block (b, b)  -> 0 where src_mask attends, -1e9 where masked
    #   block (b, b') -> -1e9  (no cross-batch attention in the folded layout)
    src_bias = jnp.where(src_mask[:, 0] == 0, -1e9, 0.0).astype(jnp.float32)  # (B, S, Sk)
    eye = jnp.eye(B, dtype=jnp.float32)
    mask4 = (src_bias[:, :, None, :] * eye[:, None, :, None]
             + (1.0 - eye)[:, None, :, None] * (-1e9))                        # (B, S, B, Sk)
    mask_bias = mask4.reshape(BS, B * S_key)

    # Flat (6,) [alpha0, bias0, alpha1, bias1, alpha2, bias2] -> SMEM scalars
    norm_flat = jnp.concatenate([
        params["norm0_alpha"], params["norm0_bias"],
        params["norm1_alpha"], params["norm1_bias"],
        params["norm2_alpha"], params["norm2_bias"]]).astype(jnp.float32)

    # Pack all 20 weight/bias tensors into ONE slab -> a single DMA descriptor.
    layout, n_rows = _slab_layout(E, F)
    slab = jnp.zeros((n_rows, max(E, F)), jnp.float32)
    entries = {}
    for pfx, p in (("sa", params["self_attn"]), ("ca", params["cross_attn"])):
        for name in ("wq", "wk", "wv", "wo", "bq", "bk", "bv", "bo"):
            entries[f"{pfx}_{name}"] = p[name]
    entries.update(ff_w1=params["ff"]["w1"], ff_b1=params["ff"]["b1"],
                   ff_w2=params["ff"]["w2"], ff_b2=params["ff"]["b2"])
    for name, arr in entries.items():
        r0, rows, cols = layout[name]
        slab = slab.at[r0:r0 + rows, :cols].set(
            arr.reshape(rows, cols).astype(jnp.float32))

    kernel = functools.partial(_decoder_layer_kernel,
                               num_heads=num_heads, ff_dim=F, eps=eps)
    vmem = pl.BlockSpec(memory_space=pltpu.MemorySpace.VMEM)
    out = pl.pallas_call(
        kernel,
        out_shape=jax.ShapeDtypeStruct((BS, E), x.dtype),
        in_specs=[vmem,                                               # x (folded)
                  vmem,                                               # encoder output (folded)
                  vmem,                                               # additive mask bias
                  pl.BlockSpec(memory_space=pltpu.MemorySpace.SMEM),  # norm alpha/bias scalars
                  vmem],                                              # packed weight slab
        out_specs=vmem,
    )(x2, enc2, mask_bias, norm_flat, slab)
    return out.reshape(B, S, E)


# ------------------------------ pure-JAX reference ------------------------------
def decoder_layer_ref(x, enc_out, src_mask, params, num_heads, eps):
    B, S, E = x.shape
    d = E // num_heads

    def addnorm(z, alpha, bias):
        mean = jnp.mean(z, -1, keepdims=True)
        var = jnp.sum((z - mean) ** 2, -1, keepdims=True) / (E - 1)
        return alpha * (z - mean) / (jnp.sqrt(var) + eps) + bias

    def split(t, n):
        return t.reshape(B, n, num_heads, d).transpose(0, 2, 1, 3)

    def mha(xq, xkv, mask, p):
        Sq, Skv = xq.shape[1], xkv.shape[1]
        q = xq @ p["wq"] + p["bq"]
        k = xkv @ p["wk"] + p["bk"]
        v = xkv @ p["wv"] + p["bv"]
        qh, kh, vh = split(q, Sq), split(k, Skv), split(v, Skv)
        s = jnp.einsum("bhqd,bhkd->bhqk", qh, kh) / math.sqrt(d)
        s = jnp.where(mask == 0, -1e9, s)
        a = jax.nn.softmax(s, axis=-1)
        o = jnp.einsum("bhqk,bhkd->bhqd", a, vh)
        o = o.transpose(0, 2, 1, 3).reshape(B, Sq, E)
        return o @ p["wo"] + p["bo"]

    def ffn(z, p):
        return jnp.maximum(z @ p["w1"] + p["b1"], 0.0) @ p["w2"] + p["b2"]

    h = addnorm(x, params["norm0_alpha"], params["norm0_bias"])
    x = x + mha(h, h, src_mask, params["self_attn"])
    h = addnorm(x, params["norm1_alpha"], params["norm1_bias"])
    x = x + mha(h, enc_out, src_mask, params["cross_attn"])
    h = addnorm(x, params["norm2_alpha"], params["norm2_bias"])
    return x + ffn(h, params["ff"])


# --------------------------------- init / main ----------------------------------
def _init_linear(key, fan_in, fan_out):
    bound = 1.0 / math.sqrt(fan_in)
    kw, kb = jax.random.split(key)
    w = jax.random.uniform(kw, (fan_in, fan_out), jnp.float32, -bound, bound)
    b = jax.random.uniform(kb, (fan_out,), jnp.float32, -bound, bound)
    return w, b


def init_params(key, E, F):
    ks = jax.random.split(key, 3)

    def attn_params(k):
        k0, k1, k2, k3 = jax.random.split(k, 4)
        wq, bq = _init_linear(k0, E, E)
        wk, bk = _init_linear(k1, E, E)
        wv, bv = _init_linear(k2, E, E)
        wo, bo = _init_linear(k3, E, E)
        return dict(wq=wq, bq=bq, wk=wk, bk=bk, wv=wv, bv=bv, wo=wo, bo=bo)

    kw1, kw2 = jax.random.split(ks[2])
    w1, b1 = _init_linear(kw1, E, F)
    w2, b2 = _init_linear(kw2, F, E)

    ones = jnp.ones((1,), jnp.float32)    # alpha = torch.ones(1)
    zeros = jnp.zeros((1,), jnp.float32)  # bias  = torch.zeros(1)

    return dict(
        self_attn=attn_params(ks[0]),
        cross_attn=attn_params(ks[1]),
        ff=dict(w1=w1, b1=b1, w2=w2, b2=b2),
        norm0_alpha=ones, norm0_bias=zeros,
        norm1_alpha=ones, norm1_bias=zeros,
        norm2_alpha=ones, norm2_bias=zeros,
    )


if __name__ == "__main__":
    B, S, E, H, F = 2, 8, 32, 4, 64
    # Quirk of the reference code: addNormLayer(features) -> eps = features
    eps = float(E)

    key = jax.random.PRNGKey(0)
    k_x, k_enc, k_p = jax.random.split(key, 3)
    x = jax.random.normal(k_x, (B, S, E), jnp.float32)
    enc_out = jax.random.normal(k_enc, (B, S, E), jnp.float32)

    # src mask: 1 = attend, 0 = masked (last key position padded out)
    src_mask = jnp.ones((B, 1, S, S), jnp.float32).at[:, :, :, S - 1].set(0.0)
    # target mask is constructed but never used by the reference forward
    target_mask = jnp.broadcast_to(
        jnp.tril(jnp.ones((S, S), jnp.float32))[None, None], (B, 1, S, S))

    params = init_params(k_p, E, F)

    out = decoder_layer(x, enc_out, src_mask, target_mask, params, H, eps)
    out = jax.block_until_ready(out)

    ref = decoder_layer_ref(x, enc_out, src_mask, params, H, eps)
    assert out.shape == (B, S, E) and out.dtype == jnp.float32
    assert bool(jnp.all(jnp.isfinite(out)))
    assert bool(jnp.allclose(out, ref, rtol=1e-2, atol=1e-2))
    print("KERNEL_OK")
</pallas_src>

<mosaic_0001>
module attributes {stable_mosaic.version = 11 : i64} {
  func.func @_decoder_layer_kernel(%arg0: memref<16x32xf32, #tpu.memory_space<vmem>>, %arg1: memref<16x32xf32, #tpu.memory_space<vmem>>, %arg2: memref<16x16xf32, #tpu.memory_space<vmem>>, %arg3: memref<6xf32, #tpu.memory_space<smem>>, %arg4: memref<432x64xf32, #tpu.memory_space<vmem>>, %arg5: memref<16x32xf32, #tpu.memory_space<vmem>>) attributes {dimension_semantics = [], scalar_prefetch = 0 : i64, scratch_operands = 0 : i64, tpu.core_type = #tpu.core_type<tc>} {
    %c0 = arith.constant 0 : index
    %c0_0 = arith.constant 0 : index
    %0 = vector.load %arg0[%c0, %c0_0] : memref<16x32xf32, #tpu.memory_space<vmem>>, vector<16x32xf32>
    %c0_1 = arith.constant 0 : index
    %c0_2 = arith.constant 0 : index
    %1 = vector.load %arg1[%c0_1, %c0_2] : memref<16x32xf32, #tpu.memory_space<vmem>>, vector<16x32xf32>
    %c0_3 = arith.constant 0 : index
    %c0_4 = arith.constant 0 : index
    %2 = vector.load %arg2[%c0_3, %c0_4] : memref<16x16xf32, #tpu.memory_space<vmem>>, vector<16x16xf32>
    %c0_5 = arith.constant 0 : index
    %3 = memref.load %arg3[%c0_5] : memref<6xf32, #tpu.memory_space<smem>>
    %c1 = arith.constant 1 : index
    %4 = memref.load %arg3[%c1] : memref<6xf32, #tpu.memory_space<smem>>
    %cst = arith.constant dense<0.000000e+00> : vector<16xf32>
    %5 = vector.multi_reduction <add>, %0, %cst [1] : vector<16x32xf32> to vector<16xf32>
    %6 = vector.shape_cast %5 : vector<16xf32> to vector<16x1xf32>
    %cst_6 = arith.constant 3.200000e+01 : f32
    %7 = vector.broadcast %cst_6 : f32 to vector<16x1xf32>
    %8 = arith.divf %6, %7 : vector<16x1xf32>
    %9 = vector.broadcast %8 : vector<16x1xf32> to vector<16x32xf32>
    %10 = arith.subf %0, %9 : vector<16x32xf32>
    %11 = arith.mulf %10, %10 : vector<16x32xf32>
    %cst_7 = arith.constant dense<0.000000e+00> : vector<16xf32>
    %12 = vector.multi_reduction <add>, %11, %cst_7 [1] : vector<16x32xf32> to vector<16xf32>
    %13 = vector.shape_cast %12 : vector<16xf32> to vector<16x1xf32>
    %cst_8 = arith.constant 0.0322580636 : f32
    %14 = vector.broadcast %cst_8 : f32 to vector<16x1xf32>
    %15 = arith.mulf %13, %14 : vector<16x1xf32>
    %16 = math.sqrt %15 : vector<16x1xf32>
    %cst_9 = arith.constant 3.200000e+01 : f32
    %17 = vector.broadcast %cst_9 : f32 to vector<16x1xf32>
    %18 = arith.addf %16, %17 : vector<16x1xf32>
    %19 = tpu.reciprocal %18 {approx = true} : vector<16x1xf32> -> vector<16x1xf32>
    %20 = vector.broadcast %8 : vector<16x1xf32> to vector<16x32xf32>
    %21 = arith.subf %0, %20 : vector<16x32xf32>
    %22 = vector.broadcast %3 : f32 to vector<16x32xf32>
    %23 = arith.mulf %22, %21 : vector<16x32xf32>
    %24 = vector.broadcast %19 : vector<16x1xf32> to vector<16x32xf32>
    %25 = arith.mulf %23, %24 : vector<16x32xf32>
    %26 = vector.broadcast %4 : f32 to vector<16x32xf32>
    %27 = arith.addf %25, %26 : vector<16x32xf32>
    %c0_10 = arith.constant 0 : index
    %c0_11 = arith.constant 0 : index
    %28 = vector.load %arg4[%c0_10, %c0_11] : memref<432x64xf32, #tpu.memory_space<vmem>>, vector<32x32xf32>
    %cst_12 = arith.constant dense<0.000000e+00> : vector<16x32xf32>
    %29 = tpu.matmul %27, %28, %cst_12 {dimension_numbers = #tpu.dot_dimension_numbers<[1], [0], [0], [1], [0, 0, 1, 1], [], []>} : vector<16x32xf32>, vector<32x32xf32>, vector<16x32xf32> -> vector<16x32xf32>
    %c128 = arith.constant 128 : index
    %c0_13 = arith.constant 0 : index
    %30 = vector.load %arg4[%c128, %c0_13] : memref<432x64xf32, #tpu.memory_space<vmem>>, vector<1x32xf32>
    %31 = vector.broadcast %30 : vector<1x32xf32> to vector<16x32xf32>
    %32 = arith.addf %29, %31 : vector<16x32xf32>
    %c32 = arith.constant 32 : index
    %c0_14 = arith.constant 0 : index
    %33 = vector.load %arg4[%c32, %c0_14] : memref<432x64xf32, #tpu.memory_space<vmem>>, vector<32x32xf32>
    %cst_15 = arith.constant dense<0.000000e+00> : vector<16x32xf32>
    %34 = tpu.matmul %27, %33, %cst_15 {dimension_numbers = #tpu.dot_dimension_numbers<[1], [0], [0], [1], [0, 0, 1, 1], [], []>} : vector<16x32xf32>, vector<32x32xf32>, vector<16x32xf32> -> vector<16x32xf32>
    %c136 = arith.constant 136 : index
    %c0_16 = arith.constant 0 : index
    %35 = vector.load %arg4[%c136, %c0_16] : memref<432x64xf32, #tpu.memory_space<vmem>>, vector<1x32xf32>
    %36 = vector.broadcast %35 : vector<1x32xf32> to vector<16x32xf32>
    %37 = arith.addf %34, %36 : vector<16x32xf32>
    %c64 = arith.constant 64 : index
    %c0_17 = arith.constant 0 : index
    %38 = vector.load %arg4[%c64, %c0_17] : memref<432x64xf32, #tpu.memory_space<vmem>>, vector<32x32xf32>
    %cst_18 = arith.constant dense<0.000000e+00> : vector<16x32xf32>
    %39 = tpu.matmul %27, %38, %cst_18 {dimension_numbers = #tpu.dot_dimension_numbers<[1], [0], [0], [1], [0, 0, 1, 1], [], []>} : vector<16x32xf32>, vector<32x32xf32>, vector<16x32xf32> -> vector<16x32xf32>
    %c144 = arith.constant 144 : index
    %c0_19 = arith.constant 0 : index
    %40 = vector.load %arg4[%c144, %c0_19] : memref<432x64xf32, #tpu.memory_space<vmem>>, vector<1x32xf32>
    %41 = vector.broadcast %40 : vector<1x32xf32> to vector<16x32xf32>
    %42 = arith.addf %39, %41 : vector<16x32xf32>
    %43 = vector.shape_cast %32 : vector<16x32xf32> to vector<16x4x8xf32>
    %44 = tpu.transpose %43, [1, 0, 2] : vector<16x4x8xf32> -> vector<4x16x8xf32>
    %45 = vector.shape_cast %37 : vector<16x32xf32> to vector<16x4x8xf32>
    %46 = tpu.transpose %45, [1, 0, 2] : vector<16x4x8xf32> -> vector<4x16x8xf32>
    %47 = vector.shape_cast %42 : vector<16x32xf32> to vector<16x4x8xf32>
    %48 = tpu.transpose %47, [1, 0, 2] : vector<16x4x8xf32> -> vector<4x16x8xf32>
    %cst_20 = arith.constant dense<0.000000e+00> : vector<4x16x16xf32>
    %49 = tpu.matmul %44, %46, %cst_20 {dimension_numbers = #tpu.dot_dimension_numbers<[2], [2], [1], [1], [0, 0, 0, 1, 1, 1], [0], [0]>} : vector<4x16x8xf32>, vector<4x16x8xf32>, vector<4x16x16xf32> -> vector<4x16x16xf32>
    %cst_21 = arith.constant 0.353553385 : f32
    %50 = vector.broadcast %cst_21 : f32 to vector<4x16x16xf32>
    %51 = arith.mulf %49, %50 : vector<4x16x16xf32>
    %52 = vector.shape_cast %2 : vector<16x16xf32> to vector<1x16x16xf32>
    %53 = vector.broadcast %52 : vector<1x16x16xf32> to vector<4x16x16xf32>
    %54 = arith.addf %51, %53 : vector<4x16x16xf32>
    %cst_22 = arith.constant dense<0xFF800000> : vector<4x16xf32>
    %55 = vector.multi_reduction <maximumf>, %54, %cst_22 [2] : vector<4x16x16xf32> to vector<4x16xf32>
    %56 = vector.shape_cast %55 : vector<4x16xf32> to vector<4x16x1xf32>
    %57 = vector.broadcast %56 : vector<4x16x1xf32> to vector<4x16x16xf32>
    %58 = arith.subf %54, %57 : vector<4x16x16xf32>
    %59 = math.exp %58 : vector<4x16x16xf32>
    %cst_23 = arith.constant dense<0.000000e+00> : vector<4x16xf32>
    %60 = vector.multi_reduction <add>, %59, %cst_23 [2] : vector<4x16x16xf32> to vector<4x16xf32>
    %61 = vector.shape_cast %60 : vector<4x16xf32> to vector<4x16x1xf32>
    %62 = tpu.reciprocal %61 {approx = true} : vector<4x16x1xf32> -> vector<4x16x1xf32>
    %63 = vector.broadcast %62 : vector<4x16x1xf32> to vector<4x16x16xf32>
    %64 = arith.mulf %59, %63 : vector<4x16x16xf32>
    %cst_24 = arith.constant dense<0.000000e+00> : vector<4x16x8xf32>
    %65 = tpu.matmul %64, %48, %cst_24 {dimension_numbers = #tpu.dot_dimension_numbers<[2], [1], [1], [2], [0, 0, 0, 1, 1, 2], [0], [0]>} : vector<4x16x16xf32>, vector<4x16x8xf32>, vector<4x16x8xf32> -> vector<4x16x8xf32>
    %c96 = arith.constant 96 : index
    %c0_25 = arith.constant 0 : index
    %66 = vector.load %arg4[%c96, %c0_25] : memref<432x64xf32, #tpu.memory_space<vmem>>, vector<32x32xf32>
    %67 = vector.shape_cast %66 : vector<32x32xf32> to vector<4x8x32xf32>
    %cst_26 = arith.constant dense<0.000000e+00> : vector<4x16x32xf32>
    %68 = tpu.matmul %65, %67, %cst_26 {dimension_numbers = #tpu.dot_dimension_numbers<[2], [1], [1], [2], [0, 0, 0, 1, 1, 2], [0], [0]>} : vector<4x16x8xf32>, vector<4x8x32xf32>, vector<4x16x32xf32> -> vector<4x16x32xf32>
    %cst_27 = arith.constant dense<0.000000e+00> : vector<16x32xf32>
    %69 = vector.multi_reduction <add>, %68, %cst_27 [0] : vector<4x16x32xf32> to vector<16x32xf32>
    %c152 = arith.constant 152 : index
    %c0_28 = arith.constant 0 : index
    %70 = vector.load %arg4[%c152, %c0_28] : memref<432x64xf32, #tpu.memory_space<vmem>>, vector<1x32xf32>
    %71 = vector.broadcast %70 : vector<1x32xf32> to vector<16x32xf32>
    %72 = arith.addf %69, %71 : vector<16x32xf32>
    %73 = arith.addf %0, %72 : vector<16x32xf32>
    %c2 = arith.constant 2 : index
    %74 = memref.load %arg3[%c2] : memref<6xf32, #tpu.memory_space<smem>>
    %c3 = arith.constant 3 : index
    %75 = memref.load %arg3[%c3] : memref<6xf32, #tpu.memory_space<smem>>
    %cst_29 = arith.constant dense<0.000000e+00> : vector<16xf32>
    %76 = vector.multi_reduction <add>, %73, %cst_29 [1] : vector<16x32xf32> to vector<16xf32>
    %77 = vector.shape_cast %76 : vector<16xf32> to vector<16x1xf32>
    %cst_30 = arith.constant 3.200000e+01 : f32
    %78 = vector.broadcast %cst_30 : f32 to vector<16x1xf32>
    %79 = arith.divf %77, %78 : vector<16x1xf32>
    %80 = vector.broadcast %79 : vector<16x1xf32> to vector<16x32xf32>
    %81 = arith.subf %73, %80 : vector<16x32xf32>
    %82 = arith.mulf %81, %81 : vector<16x32xf32>
    %cst_31 = arith.constant dense<0.000000e+00> : vector<16xf32>
    %83 = vector.multi_reduction <add>, %82, %cst_31 [1] : vector<16x32xf32> to vector<16xf32>
    %84 = vector.shape_cast %83 : vector<16xf32> to vector<16x1xf32>
    %cst_32 = arith.constant 0.0322580636 : f32
    %85 = vector.broadcast %cst_32 : f32 to vector<16x1xf32>
    %86 = arith.mulf %84, %85 : vector<16x1xf32>
    %87 = math.sqrt %86 : vector<16x1xf32>
    %cst_33 = arith.constant 3.200000e+01 : f32
    %88 = vector.broadcast %cst_33 : f32 to vector<16x1xf32>
    %89 = arith.addf %87, %88 : vector<16x1xf32>
    %90 = tpu.reciprocal %89 {approx = true} : vector<16x1xf32> -> vector<16x1xf32>
    %91 = vector.broadcast %79 : vector<16x1xf32> to vector<16x32xf32>
    %92 = arith.subf %73, %91 : vector<16x32xf32>
    %93 = vector.broadcast %74 : f32 to vector<16x32xf32>
    %94 = arith.mulf %93, %92 : vector<16x32xf32>
    %95 = vector.broadcast %90 : vector<16x1xf32> to vector<16x32xf32>
    %96 = arith.mulf %94, %95 : vector<16x32xf32>
    %97 = vector.broadcast %75 : f32 to vector<16x32xf32>
    %98 = arith.addf %96, %97 : vector<16x32xf32>
    %c160 = arith.constant 160 : index
    %c0_34 = arith.constant 0 : index
    %99 = vector.load %arg4[%c160, %c0_34] : memref<432x64xf32, #tpu.memory_space<vmem>>, vector<32x32xf32>
    %cst_35 = arith.constant dense<0.000000e+00> : vector<16x32xf32>
    %100 = tpu.matmul %98, %99, %cst_35 {dimension_numbers = #tpu.dot_dimension_numbers<[1], [0], [0], [1], [0, 0, 1, 1], [], []>} : vector<16x32xf32>, vector<32x32xf32>, vector<16x32xf32> -> vector<16x32xf32>
    %c288 = arith.constant 288 : index
    %c0_36 = arith.constant 0 : index
    %101 = vector.load %arg4[%c288, %c0_36] : memref<432x64xf32, #tpu.memory_space<vmem>>, vector<1x32xf32>
    %102 = vector.broadcast %101 : vector<1x32xf32> to vector<16x32xf32>
    %103 = arith.addf %100, %102 : vector<16x32xf32>
    %c192 = arith.constant 192 : index
    %c0_37 = arith.constant 0 : index
    %104 = vector.load %arg4[%c192, %c0_37] : memref<432x64xf32, #tpu.memory_space<vmem>>, vector<32x32xf32>
    %cst_38 = arith.constant dense<0.000000e+00> : vector<16x32xf32>
    %105 = tpu.matmul %1, %104, %cst_38 {dimension_numbers = #tpu.dot_dimension_numbers<[1], [0], [0], [1], [0, 0, 1, 1], [], []>} : vector<16x32xf32>, vector<32x32xf32>, vector<16x32xf32> -> vector<16x32xf32>
    %c296 = arith.constant 296 : index
    %c0_39 = arith.constant 0 : index
    %106 = vector.load %arg4[%c296, %c0_39] : memref<432x64xf32, #tpu.memory_space<vmem>>, vector<1x32xf32>
    %107 = vector.broadcast %106 : vector<1x32xf32> to vector<16x32xf32>
    %108 = arith.addf %105, %107 : vector<16x32xf32>
    %c224 = arith.constant 224 : index
    %c0_40 = arith.constant 0 : index
    %109 = vector.load %arg4[%c224, %c0_40] : memref<432x64xf32, #tpu.memory_space<vmem>>, vector<32x32xf32>
    %cst_41 = arith.constant dense<0.000000e+00> : vector<16x32xf32>
    %110 = tpu.matmul %1, %109, %cst_41 {dimension_numbers = #tpu.dot_dimension_numbers<[1], [0], [0], [1], [0, 0, 1, 1], [], []>} : vector<16x32xf32>, vector<32x32xf32>, vector<16x32xf32> -> vector<16x32xf32>
    %c304 = arith.constant 304 : index
    %c0_42 = arith.constant 0 : index
    %111 = vector.load %arg4[%c304, %c0_42] : memref<432x64xf32, #tpu.memory_space<vmem>>, vector<1x32xf32>
    %112 = vector.broadcast %111 : vector<1x32xf32> to vector<16x32xf32>
    %113 = arith.addf %110, %112 : vector<16x32xf32>
    %114 = vector.shape_cast %103 : vector<16x32xf32> to vector<16x4x8xf32>
    %115 = tpu.transpose %114, [1, 0, 2] : vector<16x4x8xf32> -> vector<4x16x8xf32>
    %116 = vector.shape_cast %108 : vector<16x32xf32> to vector<16x4x8xf32>
    %117 = tpu.transpose %116, [1, 0, 2] : vector<16x4x8xf32> -> vector<4x16x8xf32>
    %118 = vector.shape_cast %113 : vector<16x32xf32> to vector<16x4x8xf32>
    %119 = tpu.transpose %118, [1, 0, 2] : vector<16x4x8xf32> -> vector<4x16x8xf32>
    %cst_43 = arith.constant dense<0.000000e+00> : vector<4x16x16xf32>
    %120 = tpu.matmul %115, %117, %cst_43 {dimension_numbers = #tpu.dot_dimension_numbers<[2], [2], [1], [1], [0, 0, 0, 1, 1, 1], [0], [0]>} : vector<4x16x8xf32>, vector<4x16x8xf32>, vector<4x16x16xf32> -> vector<4x16x16xf32>
    %cst_44 = arith.constant 0.353553385 : f32
    %121 = vector.broadcast %cst_44 : f32 to vector<4x16x16xf32>
    %122 = arith.mulf %120, %121 : vector<4x16x16xf32>
    %123 = vector.shape_cast %2 : vector<16x16xf32> to vector<1x16x16xf32>
    %124 = vector.broadcast %123 : vector<1x16x16xf32> to vector<4x16x16xf32>
    %125 = arith.addf %122, %124 : vector<4x16x16xf32>
    %cst_45 = arith.constant dense<0xFF800000> : vector<4x16xf32>
    %126 = vector.multi_reduction <maximumf>, %125, %cst_45 [2] : vector<4x16x16xf32> to vector<4x16xf32>
    %127 = vector.shape_cast %126 : vector<4x16xf32> to vector<4x16x1xf32>
    %128 = vector.broadcast %127 : vector<4x16x1xf32> to vector<4x16x16xf32>
    %129 = arith.subf %125, %128 : vector<4x16x16xf32>
    %130 = math.exp %129 : vector<4x16x16xf32>
    %cst_46 = arith.constant dense<0.000000e+00> : vector<4x16xf32>
    %131 = vector.multi_reduction <add>, %130, %cst_46 [2] : vector<4x16x16xf32> to vector<4x16xf32>
    %132 = vector.shape_cast %131 : vector<4x16xf32> to vector<4x16x1xf32>
    %133 = tpu.reciprocal %132 {approx = true} : vector<4x16x1xf32> -> vector<4x16x1xf32>
    %134 = vector.broadcast %133 : vector<4x16x1xf32> to vector<4x16x16xf32>
    %135 = arith.mulf %130, %134 : vector<4x16x16xf32>
    %cst_47 = arith.constant dense<0.000000e+00> : vector<4x16x8xf32>
    %136 = tpu.matmul %135, %119, %cst_47 {dimension_numbers = #tpu.dot_dimension_numbers<[2], [1], [1], [2], [0, 0, 0, 1, 1, 2], [0], [0]>} : vector<4x16x16xf32>, vector<4x16x8xf32>, vector<4x16x8xf32> -> vector<4x16x8xf32>
    %c256 = arith.constant 256 : index
    %c0_48 = arith.constant 0 : index
    %137 = vector.load %arg4[%c256, %c0_48] : memref<432x64xf32, #tpu.memory_space<vmem>>, vector<32x32xf32>
    %138 = vector.shape_cast %137 : vector<32x32xf32> to vector<4x8x32xf32>
    %cst_49 = arith.constant dense<0.000000e+00> : vector<4x16x32xf32>
    %139 = tpu.matmul %136, %138, %cst_49 {dimension_numbers = #tpu.dot_dimension_numbers<[2], [1], [1], [2], [0, 0, 0, 1, 1, 2], [0], [0]>} : vector<4x16x8xf32>, vector<4x8x32xf32>, vector<4x16x32xf32> -> vector<4x16x32xf32>
    %cst_50 = arith.constant dense<0.000000e+00> : vector<16x32xf32>
    %140 = vector.multi_reduction <add>, %139, %cst_50 [0] : vector<4x16x32xf32> to vector<16x32xf32>
    %c312 = arith.constant 312 : index
    %c0_51 = arith.constant 0 : index
    %141 = vector.load %arg4[%c312, %c0_51] : memref<432x64xf32, #tpu.memory_space<vmem>>, vector<1x32xf32>
    %142 = vector.broadcast %141 : vector<1x32xf32> to vector<16x32xf32>
    %143 = arith.addf %140, %142 : vector<16x32xf32>
    %144 = arith.addf %73, %143 : vector<16x32xf32>
    %c4 = arith.constant 4 : index
    %145 = memref.load %arg3[%c4] : memref<6xf32, #tpu.memory_space<smem>>
    %c5 = arith.constant 5 : index
    %146 = memref.load %arg3[%c5] : memref<6xf32, #tpu.memory_space<smem>>
    %cst_52 = arith.constant dense<0.000000e+00> : vector<16xf32>
    %147 = vector.multi_reduction <add>, %144, %cst_52 [1] : vector<16x32xf32> to vector<16xf32>
    %148 = vector.shape_cast %147 : vector<16xf32> to vector<16x1xf32>
    %cst_53 = arith.constant 3.200000e+01 : f32
    %149 = vector.broadcast %cst_53 : f32 to vector<16x1xf32>
    %150 = arith.divf %148, %149 : vector<16x1xf32>
    %151 = vector.broadcast %150 : vector<16x1xf32> to vector<16x32xf32>
    %152 = arith.subf %144, %151 : vector<16x32xf32>
    %153 = arith.mulf %152, %152 : vector<16x32xf32>
    %cst_54 = arith.constant dense<0.000000e+00> : vector<16xf32>
    %154 = vector.multi_reduction <add>, %153, %cst_54 [1] : vector<16x32xf32> to vector<16xf32>
    %155 = vector.shape_cast %154 : vector<16xf32> to vector<16x1xf32>
    %cst_55 = arith.constant 0.0322580636 : f32
    %156 = vector.broadcast %cst_55 : f32 to vector<16x1xf32>
    %157 = arith.mulf %155, %156 : vector<16x1xf32>
    %158 = math.sqrt %157 : vector<16x1xf32>
    %cst_56 = arith.constant 3.200000e+01 : f32
    %159 = vector.broadcast %cst_56 : f32 to vector<16x1xf32>
    %160 = arith.addf %158, %159 : vector<16x1xf32>
    %161 = tpu.reciprocal %160 {approx = true} : vector<16x1xf32> -> vector<16x1xf32>
    %162 = vector.broadcast %150 : vector<16x1xf32> to vector<16x32xf32>
    %163 = arith.subf %144, %162 : vector<16x32xf32>
    %164 = vector.broadcast %145 : f32 to vector<16x32xf32>
    %165 = arith.mulf %164, %163 : vector<16x32xf32>
    %166 = vector.broadcast %161 : vector<16x1xf32> to vector<16x32xf32>
    %167 = arith.mulf %165, %166 : vector<16x32xf32>
    %168 = vector.broadcast %146 : f32 to vector<16x32xf32>
    %169 = arith.addf %167, %168 : vector<16x32xf32>
    %c320 = arith.constant 320 : index
    %c0_57 = arith.constant 0 : index
    %170 = vector.load %arg4[%c320, %c0_57] : memref<432x64xf32, #tpu.memory_space<vmem>>, vector<32x64xf32>
    %cst_58 = arith.constant dense<0.000000e+00> : vector<16x64xf32>
    %171 = tpu.matmul %169, %170, %cst_58 {dimension_numbers = #tpu.dot_dimension_numbers<[1], [0], [0], [1], [0, 0, 1, 1], [], []>} : vector<16x32xf32>, vector<32x64xf32>, vector<16x64xf32> -> vector<16x64xf32>
    %c352 = arith.constant 352 : index
    %c0_59 = arith.constant 0 : index
    %172 = vector.load %arg4[%c352, %c0_59] : memref<432x64xf32, #tpu.memory_space<vmem>>, vector<1x64xf32>
    %173 = vector.broadcast %172 : vector<1x64xf32> to vector<16x64xf32>
    %174 = arith.addf %171, %173 : vector<16x64xf32>
    %cst_60 = arith.constant 0.000000e+00 : f32
    %175 = vector.broadcast %cst_60 : f32 to vector<16x64xf32>
    %176 = arith.maximumf %174, %175 : vector<16x64xf32>
    %c360 = arith.constant 360 : index
    %c0_61 = arith.constant 0 : index
    %177 = vector.load %arg4[%c360, %c0_61] : memref<432x64xf32, #tpu.memory_space<vmem>>, vector<64x32xf32>
    %cst_62 = arith.constant dense<0.000000e+00> : vector<16x32xf32>
    %178 = tpu.matmul %176, %177, %cst_62 {dimension_numbers = #tpu.dot_dimension_numbers<[1], [0], [0], [1], [0, 0, 1, 1], [], []>} : vector<16x64xf32>, vector<64x32xf32>, vector<16x32xf32> -> vector<16x32xf32>
    %c424 = arith.constant 424 : index
    %c0_63 = arith.constant 0 : index
    %179 = vector.load %arg4[%c424, %c0_63] : memref<432x64xf32, #tpu.memory_space<vmem>>, vector<1x32xf32>
    %180 = vector.broadcast %179 : vector<1x32xf32> to vector<16x32xf32>
    %181 = arith.addf %178, %180 : vector<16x32xf32>
    %182 = arith.addf %144, %181 : vector<16x32xf32>
    %c0_64 = arith.constant 0 : index
    %c0_65 = arith.constant 0 : index
    %183 = vector.load %arg5[%c0_64, %c0_65] : memref<16x32xf32, #tpu.memory_space<vmem>>, vector<16x32xf32>
    tpu.vector_store %arg5[%c0_64, %c0_65], %182 {strides = array<i32>} : memref<16x32xf32, #tpu.memory_space<vmem>>, vector<16x32xf32>,
    return
  }
}

</mosaic_0001>

<bundles_post_ra>
// kernel: decoder_layer.1
= control target key start
LH: loop header
LB: loop body
LE: loop exit
PB: predicated region body
PF: predicated region fallthrough
CT: control target
= control target key end

     0   :  { %10 = vsyncpa [#allocation4], 0  ;;  %s6431_s0 = inlined_call_operand.vmem [shape: f32[16,32], index: 0, kind: input, shape index: {}]   ;;  %s6432_s1 = inlined_call_operand.vmem [shape: f32[16,32], index: 1, kind: input, shape index: {}]   ;;  %s6433_s2 = inlined_call_operand.vmem [shape: f32[16,16], index: 2, kind: input, shape index: {}]   ;;  %s6434_s3 = inlined_call_operand.vmem [shape: f32[6], index: 3, kind: input, shape index: {}]   ;;  %s6435_s4 = inlined_call_operand.vmem [shape: f32[432,64], index: 4, kind: input, shape index: {}]   ;;  %s6436_s5 = inlined_call_operand.hbm [shape: f32[16,32], index: 5, kind: output, shape index: {}]  }
   0x1   :  { %11 = vsyncpa [#allocation3], 0  ;;  %s24_s20 = sshll.u32 %s6434_s3, 4  ;;  %s25_s20 = int_to_ptr.vmem [resolvable:$true] %s24_s20 }
   0x2   :  { %s5532_s21 = scalar_lea.vmem %s25_s20, 16  ;;  %p5537_p1 = scmp.lt.s32.totalorder %s25_s20, %s25_s20 }
   0x3   :  { %p5533_p0 = scmp.ne.s32.totalorder %s25_s20, %s5532_s21  ;;  %p5538_p2 = scmp.lt.s32.totalorder %s5532_s21, %s5532_s21 }
   0x5   :  { %p5539_p3 = por %p5538_p2, %p5537_p1 }
   0x7   :  { %p5540_p4 = pnand %p5539_p3, %p5533_p0 }
   0x9   :  { %5543 = shalt.err (!%p5540_p4)
}
   0xa   :  { %s5568_s22 = smov [#allocation2]  }
   0xb   :  { %27 = dma.vmem_to_smem %s25_s20, 16, %s5568_s22, [#allocation4]  }
   0xc   :  { %5564 = dma.done.wait [#allocation4], 16  }
   0xd   :  { %5565 = vsyncadd [#allocation4], 4294967280 }
   0xe   :  { %33 = sfence }
   0xf   :  { %v34_v0 = vld [vmem:[%s6431_s0] sm:$0xff]  ;;  %vm42_vm0 = vcmask 261120   ;;  %v35_v1 = vld [vmem:[%s6431_s0 + $0x8] sm:$0xff]  ;;  %v93_v14 = vld [vmem:[%s6435_s4 + $0x18] sm:$0xff]  ;;  %s40_s19 = sld [smem:[#allocation2]]  ;;  %s5569_s28 = smov 112  }
  0x10   :  { %v43_v2 = vsel %vm42_vm0, %v34_v0, 0.0  ;;  %v46_v3 = vsel %vm42_vm0, %v35_v1, 0.0  ;;  %v183_v15 = vld [vmem:[%s6435_s4 + $0x38] sm:$0xff]  ;;  %v92_v16 = vld [vmem:[%s6435_s4 + $0x10] sm:$0xff]  ;;  %5183 = vmatprep.subr.mxu0 %v93_v14  ;;  %v91_v18 = vld [vmem:[%s6435_s4 + $0x8] sm:$0xff]  ;;  %s4924_s20 = sld [smem:[#allocation2 + $0x1]] }
  0x11   :  { %44 = vadd.xlane.f32.xlu0 %v43_v2  ;;  %5194 = vmatprep.subr.mxu1 %v183_v15  ;;  %v182_v17 = vld [vmem:[%s6435_s4 + $0x30] sm:$0xff]  ;;  %v181_v19 = vld [vmem:[%s6435_s4 + $0x28] sm:$0xff]  ;;  %v90_v20 = vld [vmem:[%s6435_s4] sm:$0xff]  ;;  %s5570_s29 = smov 120   ;;  %s5571_s7 = smov 104   ;;  %vm1224_vm5 = vcmask 64512  }
  0x12   :  { %5184 = vmatpush3.msra.mxu0 %v93_v14  ;;  %5195 = vmatpush3.msra.mxu1 %v183_v15  ;;  %v180_v21 = vld [vmem:[%s6435_s4 + $0x20] sm:$0xff]  ;;  %v267_v22 = vld [vmem:[%s6435_s4 + $0x58] sm:$0xff]  ;;  %v266_v49 = vld [vmem:[%s6435_s4 + $0x50] sm:$0xff]  ;;  %v5572_v62 = vmov 1983009808   ;;  %vm1589_vm6 = vcmask 130048  }
  0x13   :  { %5185 = vmatprep.subr.mxu0 %v92_v16  ;;  %5196 = vmatprep.subr.mxu1 %v182_v17  ;;  %v265_v50 = vld [vmem:[%s6435_s4 + $0x48] sm:$0xff]  ;;  %v264_v51 = vld [vmem:[%s6435_s4 + $0x40] sm:$0xff]  ;;  %v371_v63 = vunpack.c.l.s4 %v5572_v62  ;;  %s4979_s26 = sld [smem:[#allocation2 + $0x2]]  ;;  %vm4821_vm15 = vcmask 523264   ;;  %s5574_s25 = smov [#allocation5]  }
  0x14   :  { %5186 = vmatpush3.msra.mxu0 %v92_v16  ;;  %5197 = vmatpush3.msra.mxu1 %v182_v17  ;;  %v4928_v52 = vld [vmem:[%s6435_s4 + $0x88] ss:$0 sm:$0xff]  ;;  %v4925_v58 = vld [vmem:[%s6435_s4 + $0x80] ss:$0 sm:$0xff]  ;;  %s4980_s27 = sld [smem:[#allocation2 + $0x3]]  ;;  %s4912_s3 = sshll.u32 %s5574_s25, 4  ;;  %s4913_s3 = int_to_ptr.vmem [resolvable:$true] %s4912_s3 }
  0x15   :  { %47 = vadd.xlane.f32.xlu0 %v46_v3  ;;  %5187 = vmatprep.subr.mxu0 %v91_v18  ;;  %v82_v39 = vstv %s40_s19  ;;  %v372_v3 = vunpack.c.0.s8 %v371_v63  ;;  %s5036_s16 = sld [smem:[#allocation2 + $0x5]]  ;;  %p5549_p6 = scmp.lt.s32.totalorder %s4913_s3, %s4913_s3 }
  0x16   :  { %5188 = vmatpush3.msra.mxu0 %v91_v18  ;;  %5198 = vmatprep.subr.mxu1 %v181_v19  ;;  %v87_v42 = vstv %s4924_s20 }
  0x17   :  { %5189 = vmatprep.subr.mxu0 %v90_v20  ;;  %5199 = vmatpush3.msra.mxu1 %v181_v19 }
  0x18   :  { %5190 = vmatpush3.msra.mxu0 %v90_v20  ;;  %5200 = vmatprep.subr.mxu1 %v180_v21 }
  0x19   :  { %5201 = vmatpush3.msra.mxu1 %v180_v21  ;;  %5205 = vmatprep.subr.mxu0 %v267_v22 }
  0x9a   :  { %v45_v4 = vpop.xlane.xlu0 %44 }
  0x9b   :  { %v50_v5 = vmul.f32 0.03125, %v45_v4 }
  0x9d   :  { %v5618_v6 = vsub.f32 %v34_v0, %v50_v5  ;;  %v373_v0 = vlaneseq }
  0x9e   :  { %v48_v7 = vpop.xlane.xlu0 %47 }
  0x9f   :  { %v51_v8 = vmul.f32 0.03125, %v48_v7  ;;  %v54_v9 = vmul.f32 %v5618_v6, %v5618_v6  ;;  %v83_v40 = vmul.f32 %v82_v39, %v5618_v6  ;;  %v374_v4 = vshrl.u32 %v373_v0, 7 }
  0xa1   :  { %v5622_v10 = vsub.f32 %v35_v1, %v51_v8  ;;  %v56_v11 = vsel %vm42_vm0, %v54_v9, 0.0  ;;  %v5573_v1 = vmov 1934713408   ;;  %v5705_v8 = vsub.s32 %v372_v3, %v374_v4 }
  0xa2   :  { %57 = vadd.xlane.f32.xlu1 %v56_v11  ;;  %v403_v2 = vunpack.c.l.s4 %v5573_v1 }
  0xa3   :  { %v55_v12 = vmul.f32 %v5622_v10, %v5622_v10  ;;  %v84_v44 = vmul.f32 %v82_v39, %v5622_v10 }
  0xa4   :  { %v404_v7 = vunpack.c.0.s8 %v403_v2 }
  0xa5   :  { %v59_v13 = vsel %vm42_vm0, %v55_v12, 0.0 }
  0xa6   :  { %60 = vadd.xlane.f32.xlu1 %v59_v13  ;;  %v5707_v15 = vsub.s32 %v404_v7, %v374_v4 }
 0x12b   :  { %v58_v23 = vpop.xlane.xlu1 %57 }
 0x12c   :  { %v62_v24 = vmul.f32 0.032258064, %v58_v23 }
 0x12e   :  { %5440 = vrsqrt.f32 %v62_v24  ;;  %vm66_vm1 = vcmp.eq.f32.partialorder %v62_v24, inf  ;;  %v69_v29 = vand.u32 2147483648, %v62_v24  ;;  %vm68_vm2 = vcmp.eq.f32.partialorder %v62_v24, 0.0 }
 0x12f   :  { %v61_v25 = vpop.xlane.xlu1 %60 }
 0x130   :  { %v63_v26 = vmul.f32 0.032258064, %v61_v25 }
 0x132   :  { %5442 = vrsqrt.f32 %v63_v26  ;;  %vm73_vm3 = vcmp.eq.f32.partialorder %v63_v26, inf  ;;  %v76_v35 = vand.u32 2147483648, %v63_v26  ;;  %vm75_vm4 = vcmp.eq.f32.partialorder %v63_v26, 0.0 }
 0x13b   :  { %v5441_v27 = vpop.eup %5440 }
 0x13c   :  { %v65_v28 = vmul.f32 %v5441_v27, %v62_v24 }
 0x13e   :  { %v67_v30 = vsel %vm66_vm1, %v62_v24, %v65_v28 }
 0x13f   :  { %v5443_v31 = vpop.eup %5442  ;;  %v70_v32 = vsel %vm68_vm2, %v69_v29, %v67_v30 }
 0x140   :  { %v72_v33 = vmul.f32 %v5443_v31, %v63_v26  ;;  %v78_v34 = vadd.f32 32.0, %v70_v32 }
 0x142   :  { %v74_v36 = vsel %vm73_vm3, %v63_v26, %v72_v33  ;;  %5444 = vrcp.f32 %v78_v34 }
 0x143   :  { %v77_v37 = vsel %vm75_vm4, %v76_v35, %v74_v36 }
 0x144   :  { %v79_v38 = vadd.f32 32.0, %v77_v37 }
 0x146   :  { %5446 = vrcp.f32 %v79_v38 }
 0x14f   :  { %v5445_v41 = vpop.eup %5444 }
 0x150   :  { %v85_v43 = vmul.f32 %v5445_v41, %v83_v40 }
 0x152   :  { %v88_v45 = vadd.f32 %v87_v42, %v85_v43 }
 0x153   :  { %v5447_v46 = vpop.eup %5446 }
 0x154   :  { %v86_v47 = vmul.f32 %v5447_v46, %v84_v44  ;;  %5191 = vmatprep.mubr.msk.f32.mxu0 %vm42_vm0, %v88_v45  ;;  %5202 = vmatprep.mubr.msk.f32.mxu1 %vm42_vm0, %v88_v45 }
 0x156   :  { %v89_v48 = vadd.f32 %v87_v42, %v86_v47 }
 0x158   :  { %5192 = vmatmul.mubr.msk.f32.vlgmr.msra.gmra.mxu0 %vm42_vm0, %v89_v48  ;;  %5203 = vmatmul.mubr.msk.f32.vlgmr.msra.gmra.mxu1 %vm42_vm0, %v89_v48 }
 0x159   :  { %5206 = vmatpush3.msra.mxu0 %v267_v22  ;;  %5213 = vmatprep.mubr.msk.f32.mxu0 %vm42_vm0, %v88_v45 }
 0x15a   :  { %5207 = vmatprep.subr.mxu0 %v266_v49 }
 0x15b   :  { %5208 = vmatpush3.msra.mxu0 %v266_v49 }
 0x15c   :  { %5209 = vmatprep.subr.mxu0 %v265_v50 }
 0x15d   :  { %5210 = vmatpush3.msra.mxu0 %v265_v50 }
 0x15e   :  { %5211 = vmatprep.subr.mxu0 %v264_v51 }
 0x15f   :  { %5212 = vmatpush3.msra.mxu0 %v264_v51 }
 0x160   :  { %5214 = vmatmul.mubr.msk.f32.vlgmr.msra.gmra.mxu0 %vm42_vm0, %v89_v48 }
 0x218   :  { %v5204_v53 = vpop.f32.mrf.mxu1  ;;  %v5193_v55 = vpop.f32.mrf.mxu0 }
 0x219   :  { %v261_v54 = vadd.f32 %v5204_v53, %v4928_v52  ;;  %v5685_v60 = vadd.f32 %v5193_v55, %v4925_v58 }
 0x21a   :  { %v255_v56 = vpop.f32.mrf.mxu1  ;;  %v171_v59 = vpop.f32.mrf.mxu0 }
 0x21b   :  { %650 = vrot.lane.b32.xlu1 %v261_v54, %s5569_s28  ;;  %644 = vrot.lane.b32.xlu0 %v261_v54, %s5570_s29  ;;  %v5677_v57 = vadd.f32 %v4928_v52, %v255_v56  ;;  %v5687_v61 = vadd.f32 %v4925_v58, %v171_v59 }
 0x21f   :  { %656 = vrot.lane.b32.xlu1 %v261_v54, %s5571_s7  ;;  %648 = vrot.lane.b32.xlu0 %v5677_v57, %s5569_s28 }
 0x223   :  { %352 = vrot.lane.b32.xlu1 %v5685_v60, %s5570_s29  ;;  %350 = vrot.lane.b32.xlu0 %v5687_v61, %s5570_s29 }
 0x227   :  { %642 = vrot.lane.b32.xlu1 %v5677_v57, %s5570_s29  ;;  %362 = vrot.lane.b32.xlu0 %v5687_v61, %s5571_s7 }
 0x22b   :  { %654 = vrot.lane.b32.xlu1 %v5677_v57, %s5571_s7  ;;  %358 = vrot.lane.b32.xlu0 %v5685_v60, %s5569_s28 }
 0x22f   :  { %356 = vrot.lane.b32.xlu1 %v5687_v61, %s5569_s28 }
 0x233   :  { %364 = vrot.lane.b32.xlu1 %v5685_v60, %s5571_s7 }
 0x28d   :  { %v651_v5 = vpop.permute.xlu1 %650  ;;  %v645_v6 = vpop.permute.xlu0 %644 }
 0x28e   :  { %v728_v9 = vcombine.low %v261_v54, %v651_v5  ;;  %v729_v10 = vcombine.high %v261_v54, %v651_v5 }
 0x290   :  { %v736_v16 = vrot.slane %v728_v9, %v5705_v8  ;;  %v743_v17 = vrot.slane %v729_v10, %v5705_v8 }
 0x291   :  { %v657_v11 = vpop.permute.xlu1 %656  ;;  %v649_v12 = vpop.permute.xlu0 %648 }
 0x292   :  { %v744_v13 = vcombine.low %v645_v6, %v657_v11  ;;  %v745_v14 = vcombine.high %v645_v6, %v657_v11  ;;  %v660_v30 = vcombine.low %v5677_v57, %v649_v12  ;;  %v661_v31 = vcombine.high %v5677_v57, %v649_v12 }
 0x294   :  { %v752_v18 = vrot.slane %v744_v13, %v5705_v8  ;;  %v759_v19 = vrot.slane %v745_v14, %v5705_v8  ;;  %v668_v44 = vrot.slane %v660_v30, %v5705_v8  ;;  %v675_v45 = vrot.slane %v661_v31, %v5705_v8 }
 0x295   :  { %v5713_v20 = vpop.permute.xlu1 %352  ;;  %v351_v21 = vpop.permute.xlu0 %350 }
 0x296   :  { %v760_v22 = vcombine.low %v736_v16, %v752_v18  ;;  %v761_v23 = vcombine.high %v736_v16, %v752_v18  ;;  %v776_v24 = vcombine.low %v743_v17, %v759_v19  ;;  %v777_v25 = vcombine.high %v743_v17, %v759_v19 }
 0x298   :  { %v768_v26 = vrot.slane %v760_v22, %v5707_v15  ;;  %v775_v27 = vrot.slane %v761_v23, %v5707_v15  ;;  %v784_v28 = vrot.slane %v776_v24, %v5707_v15  ;;  %v791_v29 = vrot.slane %v777_v25, %v5707_v15 }
 0x299   :  { %v643_v32 = vpop.permute.xlu1 %642  ;;  %v363_v33 = vpop.permute.xlu0 %362 }
 0x29a   :  { %v864_v34 = vcombine.low %v768_v26, %v775_v27  ;;  %v4940_v35 = vcombine.high %v768_v26, %v775_v27  ;;  %v880_v36 = vcombine.low %v784_v28, %v791_v29  ;;  %v4941_v37 = vcombine.high %v784_v28, %v791_v29 }
 0x29b   :  { %v384_v38 = vcombine.low %v351_v21, %v363_v33  ;;  %v385_v39 = vcombine.high %v351_v21, %v363_v33 }
 0x29c   :  { %v871_v40 = vrot.slane %v864_v34, %v5705_v8  ;;  %v879_v41 = vrot.slane %v4940_v35, %v5705_v8  ;;  %v887_v42 = vrot.slane %v880_v36, %v5705_v8  ;;  %v895_v43 = vrot.slane %v4941_v37, %v5705_v8 }
 0x29d   :  { %v392_v46 = vrot.slane %v384_v38, %v5705_v8  ;;  %v655_v47 = vpop.permute.xlu1 %654  ;;  %v359_v48 = vpop.permute.xlu0 %358  ;;  %v399_v53 = vrot.slane %v385_v39, %v5705_v8 }
 0x29e   :  { %v676_v49 = vcombine.low %v643_v32, %v655_v47  ;;  %v677_v50 = vcombine.high %v643_v32, %v655_v47  ;;  %v436_v51 = vcombine.low %v5685_v60, %v359_v48  ;;  %v437_v52 = vcombine.high %v5685_v60, %v359_v48 }
 0x29f   :  { %v896_v54 = vcombine.low %v871_v40, %v879_v41  ;;  %v912_v55 = vcombine.low %v887_v42, %v895_v43  ;;  %v897_v56 = vcombine.high %v871_v40, %v879_v41  ;;  %v913_v62 = vcombine.high %v887_v42, %v895_v43 }
 0x2a0   :  { %v684_v57 = vrot.slane %v676_v49, %v5705_v8  ;;  %v691_v58 = vrot.slane %v677_v50, %v5705_v8  ;;  %v5734_v59 = vrot.slane %v436_v51, %v5705_v8  ;;  %v5737_v63 = vrot.slane %v437_v52, %v5705_v8 }
 0x2a1   :  { %v357_v0 = vpop.permute.xlu1 %356  ;;  %v904_v1 = vrot.slane %v896_v54, %v5707_v15  ;;  %v920_v60 = vrot.slane %v912_v55, %v5707_v15  ;;  %v5742_v2 = vrot.slane %v897_v56, %v5707_v15 }
 0x2a2   :  { %v692_v3 = vcombine.low %v668_v44, %v684_v57  ;;  %v693_v4 = vcombine.high %v668_v44, %v684_v57  ;;  %v708_v5 = vcombine.low %v675_v45, %v691_v58  ;;  %v709_v6 = vcombine.high %v675_v45, %v691_v58 }
 0x2a3   :  { %v368_v7 = vcombine.low %v5687_v61, %v357_v0  ;;  %v369_v9 = vcombine.high %v5687_v61, %v357_v0  ;;  %v928_v10 = vcombine.low %v904_v1, %v920_v60  ;;  %v929_v11 = vcombine.high %v904_v1, %v920_v60 }
 0x2a4   :  { %v700_v12 = vrot.slane %v692_v3, %v5707_v15  ;;  %v707_v13 = vrot.slane %v693_v4, %v5707_v15  ;;  %v716_v14 = vrot.slane %v708_v5, %v5707_v15  ;;  %v723_v16 = vrot.slane %v709_v6, %v5707_v15 }
 0x2a5   :  { %v376_v17 = vrot.slane %v368_v7, %v5705_v8  ;;  %v383_v18 = vrot.slane %v369_v9, %v5705_v8  ;;  %5216 = vmatprep.subr.msk.mxu1 %vm1224_vm5, %v928_v10  ;;  %5223 = vmatprep.subr.msk.mxu0 %vm1224_vm5, %v929_v11  ;;  %v927_v61 = vrot.slane %v913_v62, %v5707_v15  ;;  %v365_v28 = vpop.permute.xlu1 %364 }
 0x2a6   :  { %v796_v19 = vcombine.low %v700_v12, %v707_v13  ;;  %v4938_v21 = vcombine.high %v700_v12, %v707_v13  ;;  %v812_v22 = vcombine.low %v716_v14, %v723_v16  ;;  %v4939_v23 = vcombine.high %v716_v14, %v723_v16  ;;  %5217 = vmatpush3.xpose.msk.msra.mxu1 %vm1224_vm5, %v928_v10 }
 0x2a7   :  { %v400_v24 = vcombine.low %v376_v17, %v392_v46  ;;  %v401_v25 = vcombine.high %v376_v17, %v392_v46  ;;  %v416_v26 = vcombine.low %v383_v18, %v399_v53  ;;  %v417_v27 = vcombine.high %v383_v18, %v399_v53  ;;  %5224 = vmatpush3.xpose.msk.msra.mxu0 %vm1224_vm5, %v929_v11 }
 0x2a8   :  { %v5758_v29 = vrot.slane %v796_v19, %v5705_v8  ;;  %v5761_v30 = vrot.slane %v4938_v21, %v5705_v8  ;;  %v5764_v31 = vrot.slane %v812_v22, %v5705_v8  ;;  %v5767_v32 = vrot.slane %v4939_v23, %v5705_v8 }
 0x2a9   :  { %v408_v33 = vrot.slane %v400_v24, %v5707_v15  ;;  %v415_v34 = vrot.slane %v401_v25, %v5707_v15  ;;  %v424_v35 = vrot.slane %v416_v26, %v5707_v15  ;;  %v431_v36 = vrot.slane %v417_v27, %v5707_v15 }
 0x2aa   :  { %v452_v37 = vcombine.low %v5713_v20, %v365_v28  ;;  %v453_v38 = vcombine.high %v5713_v20, %v365_v28  ;;  %v828_v39 = vcombine.low %v5758_v29, %v5761_v30  ;;  %v844_v40 = vcombine.low %v5764_v31, %v5767_v32 }
 0x2ab   :  { %v504_v41 = vcombine.low %v408_v33, %v415_v34  ;;  %v4934_v42 = vcombine.high %v408_v33, %v415_v34  ;;  %v520_v43 = vcombine.low %v424_v35, %v431_v36  ;;  %v4935_v44 = vcombine.high %v424_v35, %v431_v36 }
 0x2ac   :  { %v460_v45 = vrot.slane %v452_v37, %v5705_v8  ;;  %v467_v46 = vrot.slane %v453_v38, %v5705_v8  ;;  %v836_v47 = vrot.slane %v828_v39, %v5707_v15  ;;  %v852_v48 = vrot.slane %v844_v40, %v5707_v15 }
 0x2ad   :  { %v511_v20 = vrot.slane %v504_v41, %v5705_v8  ;;  %v519_v49 = vrot.slane %v4934_v42, %v5705_v8  ;;  %v527_v50 = vrot.slane %v520_v43, %v5705_v8  ;;  %v535_v51 = vrot.slane %v4935_v44, %v5705_v8  ;;  %v5215_v41 = vpop.f32.mrf.mxu0 }
 0x2ae   :  { %v468_v52 = vcombine.low %v5734_v59, %v460_v45  ;;  %v469_v53 = vcombine.high %v5734_v59, %v460_v45  ;;  %v484_v54 = vcombine.low %v5737_v63, %v467_v46  ;;  %v485_v55 = vcombine.high %v5737_v63, %v467_v46  ;;  %v39_v45 = vld [vmem:[%s6433_s2 + $0x8] sm:$0xff] }
 0x2af   :  { %v860_v56 = vcombine.low %v836_v47, %v852_v48  ;;  %v861_v57 = vcombine.high %v836_v47, %v852_v48  ;;  %v930_v58 = vcombine.low %v5742_v2, %v927_v61  ;;  %v536_v62 = vcombine.low %v511_v20, %v519_v49  ;;  %v5835_v42 = vpop.f32.mrf.mxu0 }
 0x2b0   :  { %v476_v0 = vrot.slane %v468_v52, %v5707_v15  ;;  %v483_v1 = vrot.slane %v469_v53, %v5707_v15  ;;  %v492_v60 = vrot.slane %v484_v54, %v5707_v15  ;;  %v499_v3 = vrot.slane %v485_v55, %v5707_v15 }
 0x2b1   :  { %5218 = vmatprep.subr.msk.mxu1 %vm1224_vm5, %v860_v56  ;;  %5225 = vmatprep.subr.msk.mxu0 %vm1224_vm5, %v861_v57  ;;  %v931_v59 = vcombine.high %v5742_v2, %v927_v61  ;;  %v544_v63 = vrot.slane %v536_v62, %v5707_v15  ;;  %v552_v4 = vcombine.low %v527_v50, %v535_v51 }
 0x2b2   :  { %v572_v5 = vcombine.low %v476_v0, %v483_v1  ;;  %v4936_v6 = vcombine.high %v476_v0, %v483_v1  ;;  %v588_v7 = vcombine.low %v492_v60, %v499_v3  ;;  %v4937_v9 = vcombine.high %v492_v60, %v499_v3  ;;  %5219 = vmatpush3.xpose.msk.msra.mxu1 %vm1224_vm5, %v860_v56 }
 0x2b3   :  { %5226 = vmatpush3.xpose.msk.msra.mxu0 %vm1224_vm5, %v861_v57  ;;  %5230 = vmatprep.subr.msk.mxu1 %vm1224_vm5, %v930_v58  ;;  %v560_v10 = vrot.slane %v552_v4, %v5707_v15  ;;  %v829_v11 = vcombine.high %v5758_v29, %v5761_v30  ;;  %v845_v2 = vcombine.high %v5764_v31, %v5767_v32 }
 0x2b4   :  { %v579_v12 = vrot.slane %v572_v5, %v5705_v8  ;;  %v587_v13 = vrot.slane %v4936_v6, %v5705_v8  ;;  %v595_v14 = vrot.slane %v588_v7, %v5705_v8  ;;  %v603_v16 = vrot.slane %v4937_v9, %v5705_v8  ;;  %5237 = vmatprep.subr.msk.mxu0 %vm1224_vm5, %v931_v59  ;;  %v5852_v6 = vld [vmem:[%s6435_s4 + $0x90] ss:$0 sm:$0xff] }
 0x2b5   :  { %v568_v17 = vcombine.low %v544_v63, %v560_v10  ;;  %v569_v18 = vcombine.high %v544_v63, %v560_v10  ;;  %v537_v61 = vcombine.high %v511_v20, %v519_v49  ;;  %v843_v22 = vrot.slane %v829_v11, %v5707_v15  ;;  %v38_v49 = vld [vmem:[%s6433_s2] sm:$0xff] }
 0x2b6   :  { %v604_v19 = vcombine.low %v579_v12, %v587_v13  ;;  %v620_v21 = vcombine.low %v595_v14, %v603_v16  ;;  %v553_v23 = vcombine.high %v527_v50, %v535_v51  ;;  %v859_v26 = vrot.slane %v845_v2, %v5707_v15 }
 0x2b7   :  { %5220 = vmatprep.mubr.msk.f32.mxu1 %vm1224_vm5, %v568_v17  ;;  %5227 = vmatprep.mubr.msk.f32.mxu0 %vm1224_vm5, %v569_v18  ;;  %v551_v27 = vrot.slane %v537_v61, %v5707_v15  ;;  %v605_v29 = vcombine.high %v579_v12, %v587_v13  ;;  %v621_v30 = vcombine.high %v595_v14, %v603_v16 }
 0x2b8   :  { %v612_v24 = vrot.slane %v604_v19, %v5707_v15  ;;  %v628_v25 = vrot.slane %v620_v21, %v5707_v15  ;;  %v567_v28 = vrot.slane %v553_v23, %v5707_v15  ;;  %v862_v33 = vcombine.low %v843_v22, %v859_v26 }
 0x2b9   :  { %v863_v35 = vcombine.high %v843_v22, %v859_v26  ;;  %v619_v37 = vrot.slane %v605_v29, %v5707_v15  ;;  %v635_v38 = vrot.slane %v621_v30, %v5707_v15  ;;  %v345_v7 = vadd.f32 %v5215_v41, %v5852_v6 }
 0x2ba   :  { %v636_v31 = vcombine.low %v612_v24, %v628_v25  ;;  %v637_v32 = vcombine.high %v612_v24, %v628_v25  ;;  %v570_v34 = vcombine.low %v551_v27, %v567_v28  ;;  %v571_v36 = vcombine.high %v551_v27, %v567_v28 }
 0x2bb   :  { %v638_v39 = vcombine.low %v619_v37, %v635_v38  ;;  %v639_v40 = vcombine.high %v619_v37, %v635_v38 }
 0x2bc   :  { %5221 = vmatmul.mubr.msk.f32.vlgmr.msra.gmra.mxu1 %vm1224_vm5, %v636_v31  ;;  %5228 = vmatmul.mubr.msk.f32.vlgmr.msra.gmra.mxu0 %vm1224_vm5, %v637_v32 }
 0x2bd   :  { %5231 = vmatpush3.xpose.msk.msra.mxu1 %vm1224_vm5, %v930_v58  ;;  %5238 = vmatpush3.xpose.msk.msra.mxu0 %vm1224_vm5, %v931_v59 }
 0x2be   :  { %5232 = vmatprep.subr.msk.mxu1 %vm1224_vm5, %v862_v33  ;;  %5234 = vmatprep.mubr.msk.f32.mxu1 %vm1224_vm5, %v570_v34 }
 0x2bf   :  { %5239 = vmatprep.subr.msk.mxu0 %vm1224_vm5, %v863_v35  ;;  %5241 = vmatprep.mubr.msk.f32.mxu0 %vm1224_vm5, %v571_v36 }
 0x2c1   :  { %5233 = vmatpush3.xpose.msk.msra.mxu1 %vm1224_vm5, %v862_v33  ;;  %5240 = vmatpush3.xpose.msk.msra.mxu0 %vm1224_vm5, %v863_v35 }
 0x2c4   :  { %5235 = vmatmul.mubr.msk.f32.vlgmr.msra.gmra.mxu1 %vm1224_vm5, %v638_v39  ;;  %5242 = vmatmul.mubr.msk.f32.vlgmr.msra.gmra.mxu0 %vm1224_vm5, %v639_v40 }
 0x37c   :  { %v5222_v43 = vpop.f32.mrf.mxu1  ;;  %v5229_v44 = vpop.f32.mrf.mxu0 }
 0x37d   :  { %v1574_v46 = vmul.f32 0.35355338, %v5222_v43  ;;  %v1576_v47 = vmul.f32 0.35355338, %v5229_v44 }
 0x37e   :  { %v1303_v48 = vpop.f32.mrf.mxu1  ;;  %v1390_v20 = vpop.f32.mrf.mxu0 }
 0x37f   :  { %v1573_v50 = vmul.f32 0.35355338, %v1303_v48  ;;  %v1584_v51 = vadd.f32 %v1576_v47, %v39_v45  ;;  %v1582_v52 = vadd.f32 %v1574_v46, %v39_v45  ;;  %v1575_v53 = vmul.f32 0.35355338, %v1390_v20 }
 0x381   :  { %v1599_v54 = vsel %vm1589_vm6, %v1584_v51, -inf  ;;  %v1593_v55 = vsel %vm1589_vm6, %v1582_v52, -inf  ;;  %v1581_v56 = vadd.f32 %v1573_v50, %v38_v49  ;;  %v1583_v60 = vadd.f32 %v1575_v53, %v38_v49 }
 0x382   :  { %1600 = vmax.xlane.f32.xlu0 %v1599_v54  ;;  %1594 = vmax.xlane.f32.xlu1 %v1593_v55 }
 0x383   :  { %v1590_v1 = vsel %vm1589_vm6, %v1581_v56, -inf  ;;  %v1596_v63 = vsel %vm1589_vm6, %v1583_v60, -inf }
 0x384   :  { %v5236_v57 = vpop.f32.mrf.mxu1  ;;  %v5243_v58 = vpop.f32.mrf.mxu0 }
 0x385   :  { %v1578_v62 = vmul.f32 0.35355338, %v5236_v57  ;;  %v1580_v0 = vmul.f32 0.35355338, %v5243_v58 }
 0x386   :  { %1591 = vmax.xlane.f32.xlu0 %v1590_v1  ;;  %v1477_v9 = vpop.f32.mrf.mxu1  ;;  %v1564_v11 = vpop.f32.mrf.mxu0 }
 0x387   :  { %v1586_v3 = vadd.f32 %v1578_v62, %v39_v45  ;;  %v1588_v4 = vadd.f32 %v1580_v0, %v39_v45  ;;  %v1577_v10 = vmul.f32 0.35355338, %v1477_v9  ;;  %v1579_v2 = vmul.f32 0.35355338, %v1564_v11 }
 0x389   :  { %v1605_v59 = vsel %vm1589_vm6, %v1586_v3, -inf  ;;  %v1611_v5 = vsel %vm1589_vm6, %v1588_v4, -inf  ;;  %v5858_v12 = vadd.f32 %v1577_v10, %v38_v49  ;;  %v5862_v14 = vadd.f32 %v1579_v2, %v38_v49 }
 0x38a   :  { %1606 = vmax.xlane.f32.xlu1 %v1605_v59  ;;  %1597 = vmax.xlane.f32.xlu0 %v1596_v63 }
 0x38b   :  { %v1602_v13 = vsel %vm1589_vm6, %v5858_v12, -inf  ;;  %v1608_v16 = vsel %vm1589_vm6, %v5862_v14, -inf }
 0x38e   :  { %1612 = vmax.xlane.f32.xlu1 %v1611_v5 }
 0x39f   :  { %936 = vrot.lane.b32.xlu1 %v345_v7, %s5570_s29 }
 0x3a0   :  { %942 = vrot.lane.b32.xlu0 %v345_v7, %s5569_s28 }
 0x3a3   :  { %948 = vrot.lane.b32.xlu1 %v345_v7, %s5571_s7 }
 0x3bf   :  { %1603 = vmax.xlane.f32.xlu0 %v1602_v13 }
 0x3c3   :  { %1609 = vmax.xlane.f32.xlu0 %v1608_v16 }
 0x40b   :  { %v1601_v17 = vpop.xlane.xlu0 %1600  ;;  %v1595_v18 = vpop.xlane.xlu1 %1594 }
 0x40c   :  { %v1617_v61 = vsub.f32 %v1584_v51, %v1601_v17  ;;  %v1615_v19 = vsub.f32 %v1582_v52, %v1595_v18 }
 0x40e   :  { %v1624_v21 = vmul.f32 1.442695, %v1615_v19  ;;  %v1628_v22 = vmul.f32 1.442695, %v1617_v61 }
 0x40f   :  { %v1592_v23 = vpop.xlane.xlu0 %1591 }
 0x410   :  { %v1614_v24 = vsub.f32 %v1581_v56, %v1592_v23  ;;  %5448 = vpow2.f32 %v1624_v21 }
 0x411   :  { %5450 = vpow2.f32 %v1628_v22 }
 0x412   :  { %v1622_v25 = vmul.f32 1.442695, %v1614_v24 }
 0x413   :  { %v1607_v26 = vpop.xlane.xlu1 %1606  ;;  %v1598_v27 = vpop.xlane.xlu0 %1597 }
 0x414   :  { %5452 = vpow2.f32 %v1622_v25  ;;  %v1619_v28 = vsub.f32 %v1586_v3, %v1607_v26  ;;  %v1616_v29 = vsub.f32 %v1583_v60, %v1598_v27 }
 0x416   :  { %v1632_v30 = vmul.f32 1.442695, %v1619_v28  ;;  %v1626_v31 = vmul.f32 1.442695, %v1616_v29  ;;  %v340_v28 = vadd.f32 %v5852_v6, %v5835_v42 }
 0x417   :  { %v1613_v32 = vpop.xlane.xlu1 %1612  ;;  %v943_v35 = vpop.permute.xlu0 %942 }
 0x418   :  { %5454 = vpow2.f32 %v1632_v30  ;;  %v1621_v33 = vsub.f32 %v1588_v4, %v1613_v32  ;;  %v1020_v37 = vcombine.low %v345_v7, %v943_v35  ;;  %v1021_v39 = vcombine.high %v345_v7, %v943_v35 }
 0x419   :  { %5456 = vpow2.f32 %v1626_v31 }
 0x41a   :  { %v1636_v34 = vmul.f32 1.442695, %v1621_v33  ;;  %v1028_v47 = vrot.slane %v1020_v37, %v5705_v8  ;;  %v1035_v48 = vrot.slane %v1021_v39, %v5705_v8 }
 0x41b   :  { %v937_v36 = vpop.permute.xlu1 %936 }
 0x41c   :  { %5458 = vpow2.f32 %v1636_v34 }
 0x41d   :  { %v5866_v38 = vpop.eup %5448 }
 0x41e   :  { %v1641_v41 = vsel %vm1589_vm6, %v5866_v38, 0.0  ;;  %v5870_v43 = vpop.eup %5450 }
 0x41f   :  { %v949_v40 = vpop.permute.xlu1 %948  ;;  %1642 = vadd.xlane.f32.xlu1 %v1641_v41  ;;  %v1647_v51 = vsel %vm1589_vm6, %v5870_v43, 0.0 }
 0x420   :  { %v1036_v44 = vcombine.low %v937_v36, %v949_v40  ;;  %v1037_v45 = vcombine.high %v937_v36, %v949_v40 }
 0x421   :  { %v5872_v46 = vpop.eup %5452 }
 0x422   :  { %v1044_v20 = vrot.slane %v1036_v44, %v5705_v8  ;;  %v1051_v49 = vrot.slane %v1037_v45, %v5705_v8  ;;  %v1638_v50 = vsel %vm1589_vm6, %v5872_v46, 0.0 }
 0x423   :  { %1639 = vadd.xlane.f32.xlu0 %v1638_v50  ;;  %1648 = vadd.xlane.f32.xlu1 %v1647_v51 }
 0x424   :  { %v1052_v52 = vcombine.low %v1028_v47, %v1044_v20  ;;  %v1053_v53 = vcombine.high %v1028_v47, %v1044_v20  ;;  %v1068_v54 = vcombine.low %v1035_v48, %v1051_v49  ;;  %v1069_v55 = vcombine.high %v1035_v48, %v1051_v49 }
 0x425   :  { %v5882_v56 = vpop.eup %5454 }
 0x426   :  { %v5457_v57 = vpop.eup %5456  ;;  %v1060_v58 = vrot.slane %v1052_v52, %v5707_v15  ;;  %v1067_v62 = vrot.slane %v1053_v53, %v5707_v15  ;;  %v1076_v0 = vrot.slane %v1068_v54, %v5707_v15  ;;  %v1083_v1 = vrot.slane %v1069_v55, %v5707_v15 }
 0x427   :  { %v1653_v60 = vsel %vm1589_vm6, %v5882_v56, 0.0  ;;  %v1644_v3 = vsel %vm1589_vm6, %v5457_v57, 0.0 }
 0x428   :  { %v1156_v59 = vcombine.low %v1060_v58, %v1067_v62  ;;  %v4944_v63 = vcombine.high %v1060_v58, %v1067_v62  ;;  %v1172_v4 = vcombine.low %v1076_v0, %v1083_v1  ;;  %v4945_v5 = vcombine.high %v1076_v0, %v1083_v1  ;;  %1654 = vadd.xlane.f32.xlu1 %v1653_v60 }
 0x429   :  { %v5891_v7 = vpop.eup %5458  ;;  %1645 = vadd.xlane.f32.xlu0 %v1644_v3 }
 0x42a   :  { %v1659_v9 = vsel %vm1589_vm6, %v5891_v7, 0.0  ;;  %v1163_v10 = vrot.slane %v1156_v59, %v5705_v8  ;;  %v1171_v11 = vrot.slane %v4944_v63, %v5705_v8  ;;  %v1179_v2 = vrot.slane %v1172_v4, %v5705_v8 }
 0x42b   :  { %v1187_v13 = vrot.slane %v4945_v5, %v5705_v8 }
 0x42c   :  { %1660 = vadd.xlane.f32.xlu1 %v1659_v9  ;;  %v1188_v16 = vcombine.low %v1163_v10, %v1171_v11  ;;  %v1189_v17 = vcombine.high %v1163_v10, %v1171_v11 }
 0x42d   :  { %v1204_v18 = vcombine.low %v1179_v2, %v1187_v13  ;;  %v1205_v61 = vcombine.high %v1179_v2, %v1187_v13 }
 0x42e   :  { %v1196_v19 = vrot.slane %v1188_v16, %v5707_v15  ;;  %v1203_v21 = vrot.slane %v1189_v17, %v5707_v15 }
 0x42f   :  { %v1212_v22 = vrot.slane %v1204_v18, %v5707_v15  ;;  %v1219_v23 = vrot.slane %v1205_v61, %v5707_v15 }
 0x431   :  { %v1220_v24 = vcombine.low %v1196_v19, %v1212_v22  ;;  %v1221_v25 = vcombine.high %v1196_v19, %v1212_v22  ;;  %v5903_v26 = vcombine.low %v1203_v21, %v1219_v23  ;;  %v5905_v27 = vcombine.high %v1203_v21, %v1219_v23 }
 0x433   :  { %5244 = vmatprep.subr.mxu0 %v1220_v24  ;;  %5251 = vmatprep.subr.mxu1 %v1221_v25 }
 0x434   :  { %5245 = vmatpush3.msra.mxu0 %v1220_v24  ;;  %5252 = vmatpush3.msra.mxu1 %v1221_v25 }
 0x43f   :  { %934 = vrot.lane.b32.xlu0 %v340_v28, %s5570_s29 }
 0x443   :  { %940 = vrot.lane.b32.xlu0 %v340_v28, %s5569_s28 }
 0x448   :  { %v1604_v29 = vpop.xlane.xlu0 %1603 }
 0x449   :  { %v1618_v30 = vsub.f32 %v5858_v12, %v1604_v29 }
 0x44b   :  { %v1630_v32 = vmul.f32 1.442695, %v1618_v30 }
 0x44c   :  { %v1610_v31 = vpop.xlane.xlu0 %1609 }
 0x44d   :  { %v1620_v33 = vsub.f32 %v5862_v14, %v1610_v31  ;;  %5460 = vpow2.f32 %v1630_v32 }
 0x44f   :  { %v1634_v34 = vmul.f32 1.442695, %v1620_v33 }
 0x451   :  { %5462 = vpow2.f32 %v1634_v34 }
 0x45a   :  { %v5913_v35 = vpop.eup %5460 }
 0x45b   :  { %v1650_v36 = vsel %vm1589_vm6, %v5913_v35, 0.0 }
 0x45e   :  { %v5917_v42 = vpop.eup %5462 }
 0x45f   :  { %v1656_v6 = vsel %vm1589_vm6, %v5917_v42, 0.0 }
 0x462   :  { %1651 = vadd.xlane.f32.xlu0 %v1650_v36 }
 0x466   :  { %1657 = vadd.xlane.f32.xlu0 %v1656_v6 }
 0x47c   :  { %946 = vrot.lane.b32.xlu0 %v340_v28, %s5571_s7 }
 0x4a8   :  { %v1643_v45 = vpop.xlane.xlu1 %1642 }
 0x4ac   :  { %v1640_v12 = vpop.xlane.xlu0 %1639  ;;  %v1649_v20 = vpop.xlane.xlu1 %1648 }
 0x4ad   :  { %5464 = vrcp.f32 %v1640_v12 }
 0x4b1   :  { %v1655_v50 = vpop.xlane.xlu1 %1654 }
 0x4b2   :  { %v1646_v14 = vpop.xlane.xlu0 %1645 }
 0x4b3   :  { %5466 = vrcp.f32 %v1646_v14 }
 0x4b4   :  { %5468 = vrcp.f32 %v1643_v45 }
 0x4b5   :  { %5470 = vrcp.f32 %v1649_v20  ;;  %v1661_v0 = vpop.xlane.xlu1 %1660 }
 0x4b6   :  { %v935_v44 = vpop.permute.xlu0 %934  ;;  %5472 = vrcp.f32 %v1655_v50 }
 0x4ba   :  { %v5465_v37 = vpop.eup %5464  ;;  %v941_v47 = vpop.permute.xlu0 %940 }
 0x4bb   :  { %v1670_v39 = vmul.f32 %v5465_v37, %v5872_v46  ;;  %v952_v51 = vcombine.low %v340_v28, %v941_v47  ;;  %v953_v52 = vcombine.high %v340_v28, %v941_v47 }
 0x4bd   :  { %5248 = vmatprep.mubr.msk.f32.mxu0 %vm1589_vm6, %v1670_v39  ;;  %v960_v55 = vrot.slane %v952_v51, %v5705_v8 }
 0x4c0   :  { %v5467_v40 = vpop.eup %5466 }
 0x4c1   :  { %v1672_v41 = vmul.f32 %v5467_v40, %v5457_v57  ;;  %v967_v57 = vrot.slane %v953_v52, %v5705_v8  ;;  %v5469_v19 = vpop.eup %5468 }
 0x4c2   :  { %v5471_v23 = vpop.eup %5470  ;;  %v1671_v34 = vmul.f32 %v5469_v19, %v5866_v38 }
 0x4c3   :  { %5255 = vmatprep.mubr.msk.f32.mxu1 %vm1589_vm6, %v1672_v41  ;;  %v5473_v24 = vpop.eup %5472  ;;  %v1673_v6 = vmul.f32 %v5471_v23, %v5870_v43 }
 0x4eb   :  { %v1652_v48 = vpop.xlane.xlu0 %1651 }
 0x4ec   :  { %5474 = vrcp.f32 %v1652_v48 }
 0x4ef   :  { %v1658_v49 = vpop.xlane.xlu0 %1657 }
 0x4f0   :  { %5476 = vrcp.f32 %v1658_v49 }
 0x4f1   :  { %5478 = vrcp.f32 %v1661_v0 }
 0x4f3   :  { %v947_v53 = vpop.permute.xlu0 %946 }
 0x4f4   :  { %v968_v54 = vcombine.low %v935_v44, %v947_v53  ;;  %v969_v46 = vcombine.high %v935_v44, %v947_v53 }
 0x4f6   :  { %v976_v58 = vrot.slane %v968_v54, %v5705_v8  ;;  %v983_v62 = vrot.slane %v969_v46, %v5705_v8 }
 0x4f8   :  { %v984_v1 = vcombine.low %v960_v55, %v976_v58  ;;  %v985_v60 = vcombine.high %v960_v55, %v976_v58  ;;  %v1000_v3 = vcombine.low %v967_v57, %v983_v62  ;;  %v1001_v59 = vcombine.high %v967_v57, %v983_v62 }
 0x4f9   :  { %v5475_v31 = vpop.eup %5474 }
 0x4fa   :  { %v992_v63 = vrot.slane %v984_v1, %v5707_v15  ;;  %v999_v4 = vrot.slane %v985_v60, %v5707_v15  ;;  %v1008_v5 = vrot.slane %v1000_v3, %v5707_v15  ;;  %v1015_v9 = vrot.slane %v1001_v59, %v5707_v15 }
 0x4fb   :  { %v1674_v39 = vmul.f32 %v5475_v31, %v5913_v35  ;;  %v1675_v35 = vmul.f32 %v5473_v24, %v5882_v56  ;;  %v2004_v56 = vld [vmem:[%s6435_s4 + $0x70] sm:$0xff]  ;;  %v2491_v31 = vld [vmem:[%s6435_s4 + $0xc0] sm:$0xff] }
 0x4fc   :  { %v1088_v10 = vcombine.low %v992_v63, %v999_v4  ;;  %v4942_v11 = vcombine.high %v992_v63, %v999_v4  ;;  %v1104_v2 = vcombine.low %v1008_v5, %v1015_v9  ;;  %v4943_v13 = vcombine.high %v1008_v5, %v1015_v9  ;;  %v4978_v9 = vld [vmem:[%s6435_s4 + $0x98] ss:$0 sm:$0xff] }
 0x4fd   :  { %v5477_v36 = vpop.eup %5476 }
 0x4fe   :  { %v1095_v16 = vrot.slane %v1088_v10, %v5705_v8  ;;  %v1103_v17 = vrot.slane %v4942_v11, %v5705_v8  ;;  %v1111_v18 = vrot.slane %v1104_v2, %v5705_v8  ;;  %v1119_v61 = vrot.slane %v4943_v13, %v5705_v8  ;;  %v5479_v37 = vpop.eup %5478 }
 0x4ff   :  { %v1676_v38 = vmul.f32 %v5477_v36, %v5917_v42  ;;  %v1677_v41 = vmul.f32 %v5479_v37, %v5891_v7  ;;  %v2005_v7 = vld [vmem:[%s6435_s4 + $0x78] sm:$0xff] }
 0x500   :  { %v1120_v21 = vcombine.low %v1095_v16, %v1103_v17  ;;  %v1136_v22 = vcombine.low %v1111_v18, %v1119_v61  ;;  %v1121_v29 = vcombine.high %v1095_v16, %v1103_v17  ;;  %v1137_v30 = vcombine.high %v1111_v18, %v1119_v61  ;;  %v5528_v61 = vld [vmem:[%s6431_s0 + $0x8] sm:$0xff] }
 0x502   :  { %v1128_v25 = vrot.slane %v1120_v21, %v5707_v15  ;;  %v1144_v28 = vrot.slane %v1136_v22, %v5707_v15  ;;  %v1135_v12 = vrot.slane %v1121_v29, %v5707_v15  ;;  %v1151_v14 = vrot.slane %v1137_v30, %v5707_v15  ;;  %v5529_v22 = vld [vmem:[%s6431_s0] sm:$0xff]  ;;  %v2492_v30 = vld [vmem:[%s6435_s4 + $0xc8] sm:$0xff] }
 0x503   :  { %v6011_v29 = vld [vmem:[%s6432_s1] sm:$0xff] }
 0x504   :  { %v1152_v32 = vcombine.low %v1128_v25, %v1144_v28  ;;  %v1153_v33 = vcombine.high %v1128_v25, %v1144_v28  ;;  %v1154_v43 = vcombine.low %v1135_v12, %v1151_v14  ;;  %v1155_v40 = vcombine.high %v1135_v12, %v1151_v14  ;;  %v2494_v25 = vld [vmem:[%s6435_s4 + $0xd8] sm:$0xff]  ;;  %v2493_v28 = vld [vmem:[%s6435_s4 + $0xd0] sm:$0xff] }
 0x506   :  { %5246 = vmatprep.subr.mxu0 %v1152_v32  ;;  %5253 = vmatprep.subr.mxu1 %v1153_v33 }
 0x507   :  { %5247 = vmatpush3.msra.mxu0 %v1152_v32  ;;  %5254 = vmatpush3.msra.mxu1 %v1153_v33  ;;  %v6024_v32 = vld [vmem:[%s6432_s1 + $0x8] sm:$0xff]  ;;  %s5035_s1 = sld [smem:[#allocation2 + $0x4]] }
 0x508   :  { %5249 = vmatmul.mubr.msk.f32.vlgmr.msra.gmra.mxu0 %vm1589_vm6, %v1671_v34  ;;  %5256 = vmatmul.mubr.msk.f32.vlgmr.msra.gmra.mxu1 %vm1589_vm6, %v1673_v6 }
 0x509   :  { %5258 = vmatprep.subr.mxu0 %v5903_v26  ;;  %5265 = vmatprep.subr.mxu1 %v5905_v27 }
 0x50a   :  { %5259 = vmatpush3.msra.mxu0 %v5903_v26  ;;  %5262 = vmatprep.mubr.msk.f32.mxu0 %vm1589_vm6, %v1674_v39  ;;  %v2002_v26 = vld [vmem:[%s6435_s4 + $0x60] sm:$0xff] }
 0x50b   :  { %5266 = vmatpush3.msra.mxu1 %v5905_v27  ;;  %5269 = vmatprep.mubr.msk.f32.mxu1 %vm1589_vm6, %v1676_v38  ;;  %v2003_v27 = vld [vmem:[%s6435_s4 + $0x68] sm:$0xff] }
 0x50c   :  { %5260 = vmatprep.subr.mxu0 %v1154_v43  ;;  %5267 = vmatprep.subr.mxu1 %v1155_v40 }
 0x50d   :  { %5261 = vmatpush3.msra.mxu0 %v1154_v43  ;;  %5268 = vmatpush3.msra.mxu1 %v1155_v40  ;;  %v2404_v40 = vld [vmem:[%s6435_s4 + $0xb8] sm:$0xff] }
 0x50e   :  { %5263 = vmatmul.mubr.msk.f32.vlgmr.msra.gmra.mxu0 %vm1589_vm6, %v1675_v35  ;;  %5270 = vmatmul.mubr.msk.f32.vlgmr.msra.gmra.mxu1 %vm1589_vm6, %v1677_v41  ;;  %v2403_v35 = vld [vmem:[%s6435_s4 + $0xb0] sm:$0xff]  ;;  %v2402_v41 = vld [vmem:[%s6435_s4 + $0xa8] sm:$0xff] }
 0x50f   :  { %5272 = vmatprep.subr.mxu0 %v2002_v26  ;;  %5277 = vmatprep.subr.mxu1 %v2003_v27 }
 0x510   :  { %5273 = vmatpush3.msra.mxu0 %v2002_v26  ;;  %5278 = vmatpush3.msra.mxu1 %v2003_v27  ;;  %v2401_v26 = vld [vmem:[%s6435_s4 + $0xa0] sm:$0xff]  ;;  %v4984_v27 = vld [vmem:[%s6435_s4 + $0x128] ss:$0 sm:$0xff] }
 0x511   :  { %5282 = vmatprep.subr.mxu0 %v2004_v56  ;;  %5287 = vmatprep.subr.mxu1 %v2005_v7 }
 0x5c8   :  { %v5250_v42 = vpop.f32.mrf.mxu0  ;;  %v5257_v44 = vpop.f32.mrf.mxu1 }
 0x5ca   :  { %v1750_v45 = vpop.f32.mrf.mxu0  ;;  %v1831_v47 = vpop.f32.mrf.mxu1 }
 0x5cb   :  { %5274 = vmatprep.mubr.msk.f32.mxu0 %vm1224_vm5, %v1750_v45  ;;  %5279 = vmatprep.mubr.msk.f32.mxu1 %vm1224_vm5, %v1831_v47  ;;  %v2584_v45 = vld [vmem:[%s6435_s4 + $0xf8] sm:$0xff] }
 0x5cc   :  { %5275 = vmatmul.mubr.msk.f32.vlgmr.msra.gmra.mxu0 %vm1224_vm5, %v5250_v42  ;;  %5280 = vmatmul.mubr.msk.f32.vlgmr.msra.gmra.mxu1 %vm1224_vm5, %v5257_v44 }
 0x5cd   :  { %5283 = vmatpush3.msra.mxu0 %v2004_v56  ;;  %5288 = vmatpush3.msra.mxu1 %v2005_v7 }
 0x5ce   :  { %v5264_v48 = vpop.f32.mrf.mxu0  ;;  %v5271_v20 = vpop.f32.mrf.mxu1  ;;  %5303 = vmatprep.subr.mxu1 %v2494_v25  ;;  %5292 = vmatprep.subr.mxu0 %v2404_v40 }
 0x5d0   :  { %v1912_v49 = vpop.f32.mrf.mxu0  ;;  %v1993_v50 = vpop.f32.mrf.mxu1 }
 0x5d1   :  { %5284 = vmatprep.mubr.msk.f32.mxu0 %vm1224_vm5, %v1912_v49  ;;  %5289 = vmatprep.mubr.msk.f32.mxu1 %vm1224_vm5, %v1993_v50 }
 0x5d2   :  { %5285 = vmatmul.mubr.msk.f32.vlgmr.msra.gmra.mxu0 %vm1224_vm5, %v5264_v48  ;;  %5290 = vmatmul.mubr.msk.f32.vlgmr.msra.gmra.mxu1 %vm1224_vm5, %v5271_v20 }
 0x5d3   :  { %5304 = vmatpush3.msra.mxu1 %v2494_v25  ;;  %5311 = vmatprep.mubr.msk.f32.mxu1 %vm42_vm0, %v6011_v29 }
 0x5d4   :  { %5305 = vmatprep.subr.mxu1 %v2493_v28  ;;  %5293 = vmatpush3.msra.mxu0 %v2404_v40 }
 0x5d5   :  { %5306 = vmatpush3.msra.mxu1 %v2493_v28  ;;  %5294 = vmatprep.subr.mxu0 %v2403_v35 }
 0x5d6   :  { %5307 = vmatprep.subr.mxu1 %v2492_v30  ;;  %5295 = vmatpush3.msra.mxu0 %v2403_v35 }
 0x5d7   :  { %5308 = vmatpush3.msra.mxu1 %v2492_v30  ;;  %5296 = vmatprep.subr.mxu0 %v2402_v41 }
 0x5d8   :  { %5309 = vmatprep.subr.mxu1 %v2491_v31  ;;  %5297 = vmatpush3.msra.mxu0 %v2402_v41 }
 0x5d9   :  { %5310 = vmatpush3.msra.mxu1 %v2491_v31  ;;  %5298 = vmatprep.subr.mxu0 %v2401_v26 }
 0x5da   :  { %5312 = vmatmul.mubr.msk.f32.vlgmr.msra.gmra.mxu1 %vm42_vm0, %v6024_v32  ;;  %5299 = vmatpush3.msra.mxu0 %v2401_v26 }
 0x5db   :  { %5314 = vmatprep.subr.mxu0 %v2584_v45 }
 0x68c   :  { %v5276_v51 = vpop.f32.mrf.mxu0  ;;  %v5281_v52 = vpop.f32.mrf.mxu1 }
 0x68d   :  { %v2337_v46 = vsel %vm42_vm0, %v5276_v51, 0.0  ;;  %v2338_v55 = vsel %vm42_vm0, %v5281_v52, 0.0 }
 0x68e   :  { %v2078_v53 = vpop.f32.mrf.mxu0  ;;  %v2159_v54 = vpop.f32.mrf.mxu1  ;;  %v2339_v62 = vadd.f32 %v2338_v55, %v2337_v46 }
 0x68f   :  { %v2330_v57 = vsel %vm42_vm0, %v2078_v53, 0.0  ;;  %v2331_v58 = vsel %vm42_vm0, %v2159_v54, 0.0 }
 0x690   :  { %v2332_v3 = vadd.f32 %v2331_v58, %v2330_v57 }
 0x692   :  { %v5286_v0 = vpop.f32.mrf.mxu0  ;;  %v5291_v1 = vpop.f32.mrf.mxu1 }
 0x693   :  { %v2340_v60 = vsel %vm42_vm0, %v5286_v0, 0.0  ;;  %v2342_v5 = vsel %vm42_vm0, %v5291_v1, 0.0 }
 0x694   :  { %v2341_v59 = vadd.f32 %v2340_v60, %v2339_v62  ;;  %v2240_v63 = vpop.f32.mrf.mxu0  ;;  %v2321_v4 = vpop.f32.mrf.mxu1  ;;  %v2393_v60 = vstv %s4979_s26  ;;  %s5544_s26 = scalar_lea.vmem %s4913_s3, 256 }
 0x695   :  { %v2333_v10 = vsel %vm42_vm0, %v2240_v63, 0.0  ;;  %v2335_v13 = vsel %vm42_vm0, %v2321_v4, 0.0  ;;  %v2398_v63 = vstv %s4980_s27  ;;  %p5545_p5 = scmp.ne.s32.totalorder %s4913_s3, %s5544_s26  ;;  %p5550_p7 = scmp.lt.s32.totalorder %s5544_s26, %s5544_s26 }
 0x696   :  { %v2343_v11 = vadd.f32 %v2342_v5, %v2341_v59  ;;  %v2334_v2 = vadd.f32 %v2333_v10, %v2332_v3 }
 0x697   :  { %p5551_p8 = por %p5550_p7, %p5549_p6 }
 0x698   :  { %v2350_v16 = vadd.f32 %v4978_v9, %v2343_v11  ;;  %v2336_v17 = vadd.f32 %v2335_v13, %v2334_v2  ;;  %v2583_v13 = vld [vmem:[%s6435_s4 + $0xf0] sm:$0xff] }
 0x699   :  { %p5552_p9 = pnand %p5551_p8, %p5545_p5 }
 0x69a   :  { %v2349_v18 = vadd.f32 %v4978_v9, %v2336_v17  ;;  %v5991_v19 = vadd.f32 %v5528_v61, %v2350_v16  ;;  %v5313_v56 = vpop.f32.mrf.mxu1  ;;  %v2582_v16 = vld [vmem:[%s6435_s4 + $0xe8] sm:$0xff] }
 0x69b   :  { %v6051_v7 = vadd.f32 %v5313_v56, %v4984_v27 }
 0x69c   :  { %v2358_v21 = vsel %vm42_vm0, %v5991_v19, 0.0  ;;  %v5998_v23 = vadd.f32 %v5529_v22, %v2349_v18  ;;  %v2572_v42 = vpop.f32.mrf.mxu1 }
 0x69d   :  { %2359 = vadd.xlane.f32.xlu1 %v2358_v21  ;;  %v6057_v44 = vadd.f32 %v4984_v27, %v2572_v42 }
 0x69e   :  { %v2355_v24 = vsel %vm42_vm0, %v5998_v23, 0.0 }
 0x69f   :  { %2356 = vadd.xlane.f32.xlu0 %v2355_v24 }
 0x6b5   :  { %2961 = vrot.lane.b32.xlu0 %v6051_v7, %s5570_s29 }
 0x6b9   :  { %2965 = vrot.lane.b32.xlu0 %v6057_v44, %s5569_s28 }
 0x726   :  { %v2360_v33 = vpop.xlane.xlu1 %2359 }
 0x727   :  { %v2362_v34 = vmul.f32 0.03125, %v2360_v33 }
 0x728   :  { %v2357_v36 = vpop.xlane.xlu0 %2356 }
 0x729   :  { %v2361_v6 = vmul.f32 0.03125, %v2357_v36  ;;  %v6029_v12 = vsub.f32 %v5991_v19, %v2362_v34 }
 0x72b   :  { %v2363_v14 = vsub.f32 %v5998_v23, %v2361_v6  ;;  %v2366_v38 = vmul.f32 %v6029_v12, %v6029_v12  ;;  %v2395_v5 = vmul.f32 %v2393_v60, %v6029_v12 }
 0x72c   :  { %v2962_v21 = vpop.permute.xlu0 %2961 }
 0x72d   :  { %v2365_v37 = vmul.f32 %v2363_v14, %v2363_v14  ;;  %v2370_v43 = vsel %vm42_vm0, %v2366_v38, 0.0  ;;  %v2394_v3 = vmul.f32 %v2393_v60, %v2363_v14 }
 0x72f   :  { %v2367_v39 = vsel %vm42_vm0, %v2365_v37, 0.0 }
 0x730   :  { %2368 = vadd.xlane.f32.xlu1 %v2367_v39  ;;  %v2966_v31 = vpop.permute.xlu0 %2965 }
 0x731   :  { %v2977_v36 = vcombine.low %v6057_v44, %v2966_v31  ;;  %v2978_v37 = vcombine.high %v6057_v44, %v2966_v31 }
 0x733   :  { %v2985_v40 = vrot.slane %v2977_v36, %v5705_v8  ;;  %v2992_v27 = vrot.slane %v2978_v37, %v5705_v8 }
 0x734   :  { %2371 = vadd.xlane.f32.xlu1 %v2370_v43 }
 0x745   :  { %2967 = vrot.lane.b32.xlu1 %v6051_v7, %s5569_s28 }
 0x749   :  { %2973 = vrot.lane.b32.xlu1 %v6051_v7, %s5571_s7 }
 0x74d   :  { %2959 = vrot.lane.b32.xlu1 %v6057_v44, %s5570_s29 }
 0x751   :  { %2971 = vrot.lane.b32.xlu1 %v6057_v44, %s5571_s7 }
 0x7b9   :  { %v2369_v47 = vpop.xlane.xlu1 %2368 }
 0x7ba   :  { %v2373_v48 = vmul.f32 0.032258064, %v2369_v47 }
 0x7bc   :  { %5480 = vrsqrt.f32 %v2373_v48  ;;  %vm2377_vm7 = vcmp.eq.f32.partialorder %v2373_v48, inf  ;;  %v2380_v52 = vand.u32 2147483648, %v2373_v48  ;;  %vm2379_vm8 = vcmp.eq.f32.partialorder %v2373_v48, 0.0 }
 0x7bd   :  { %v2372_v20 = vpop.xlane.xlu1 %2371 }
 0x7be   :  { %v2374_v49 = vmul.f32 0.032258064, %v2372_v20 }
 0x7c0   :  { %5482 = vrsqrt.f32 %v2374_v49  ;;  %vm2384_vm9 = vcmp.eq.f32.partialorder %v2374_v49, inf  ;;  %v2387_v58 = vand.u32 2147483648, %v2374_v49  ;;  %vm2386_vm10 = vcmp.eq.f32.partialorder %v2374_v49, 0.0 }
 0x7c1   :  { %v2968_v17 = vpop.permute.xlu1 %2967 }
 0x7c2   :  { %v3045_v22 = vcombine.low %v6051_v7, %v2968_v17  ;;  %v3046_v25 = vcombine.high %v6051_v7, %v2968_v17 }
 0x7c4   :  { %v3053_v33 = vrot.slane %v3045_v22, %v5705_v8  ;;  %v3060_v6 = vrot.slane %v3046_v25, %v5705_v8 }
 0x7c5   :  { %v2974_v18 = vpop.permute.xlu1 %2973 }
 0x7c6   :  { %v3061_v24 = vcombine.low %v2962_v21, %v2974_v18  ;;  %v3062_v28 = vcombine.high %v2962_v21, %v2974_v18 }
 0x7c8   :  { %v3076_v12 = vrot.slane %v3062_v28, %v5705_v8 }
 0x7c9   :  { %v5481_v50 = vpop.eup %5480  ;;  %v2960_v61 = vpop.permute.xlu1 %2959 }
 0x7ca   :  { %v2376_v51 = vmul.f32 %v5481_v50, %v2373_v48  ;;  %v3093_v35 = vcombine.low %v3060_v6, %v3076_v12  ;;  %v3094_v41 = vcombine.high %v3060_v6, %v3076_v12 }
 0x7cc   :  { %v2378_v53 = vsel %vm2377_vm7, %v2373_v48, %v2376_v51  ;;  %v3101_v44 = vrot.slane %v3093_v35, %v5707_v15  ;;  %v3108_v47 = vrot.slane %v3094_v41, %v5707_v15 }
 0x7cd   :  { %v5483_v54 = vpop.eup %5482  ;;  %v2381_v46 = vsel %vm2379_vm8, %v2380_v52, %v2378_v53  ;;  %v2972_v30 = vpop.permute.xlu1 %2971 }
 0x7ce   :  { %v2389_v55 = vadd.f32 32.0, %v2381_v46  ;;  %v2383_v57 = vmul.f32 %v5483_v54, %v2374_v49  ;;  %v2993_v34 = vcombine.low %v2960_v61, %v2972_v30  ;;  %v2994_v14 = vcombine.high %v2960_v61, %v2972_v30 }
 0x7cf   :  { %v3197_v53 = vcombine.low %v3101_v44, %v3108_v47  ;;  %v4997_v54 = vcombine.high %v3101_v44, %v3108_v47 }
 0x7d0   :  { %5484 = vrcp.f32 %v2389_v55  ;;  %v2385_v62 = vsel %vm2384_vm9, %v2374_v49, %v2383_v57  ;;  %v3001_v43 = vrot.slane %v2993_v34, %v5705_v8  ;;  %v3008_v26 = vrot.slane %v2994_v14, %v5705_v8 }
 0x7d1   :  { %v2388_v0 = vsel %vm2386_vm10, %v2387_v58, %v2385_v62  ;;  %v3212_v60 = vrot.slane %v4997_v54, %v5705_v8 }
 0x7d2   :  { %v2390_v1 = vadd.f32 32.0, %v2388_v0  ;;  %v3009_v42 = vcombine.low %v2985_v40, %v3001_v43  ;;  %v3025_v48 = vcombine.low %v2992_v27, %v3008_v26  ;;  %v3026_v20 = vcombine.high %v2992_v27, %v3008_v26  ;;  %v6154_v26 = vld [vmem:[%s6435_s4 + $0x130] ss:$0 sm:$0xff] }
 0x7d4   :  { %5486 = vrcp.f32 %v2390_v1  ;;  %v3017_v51 = vrot.slane %v3009_v42, %v5707_v15  ;;  %v3033_v46 = vrot.slane %v3025_v48, %v5707_v15  ;;  %v3040_v55 = vrot.slane %v3026_v20, %v5707_v15 }
 0x7d5   :  { %v3204_v1 = vrot.slane %v3197_v53, %v5705_v8 }
 0x7d7   :  { %v3230_v28 = vcombine.high %v3204_v1, %v3212_v60 }
 0x7d9   :  { %v3244_v34 = vrot.slane %v3230_v28, %v5707_v15 }
 0x7dd   :  { %v5485_v59 = vpop.eup %5484 }
 0x7de   :  { %v2396_v4 = vmul.f32 %v5485_v59, %v2394_v3  ;;  %v3129_v3 = vcombine.low %v3033_v46, %v3040_v55  ;;  %v4995_v59 = vcombine.high %v3033_v46, %v3040_v55 }
 0x7e0   :  { %v2399_v9 = vadd.f32 %v2398_v63, %v2396_v4 }
 0x7e1   :  { %v5487_v10 = vpop.eup %5486 }
 0x7e2   :  { %v2397_v11 = vmul.f32 %v5487_v10, %v2395_v5  ;;  %5300 = vmatprep.mubr.msk.f32.mxu0 %vm42_vm0, %v2399_v9  ;;  %v3136_v5 = vrot.slane %v3129_v3, %v5705_v8  ;;  %v3144_v9 = vrot.slane %v4995_v59, %v5705_v8 }
 0x7e4   :  { %v2400_v2 = vadd.f32 %v2398_v63, %v2397_v11  ;;  %v3229_v11 = vcombine.low %v3204_v1, %v3212_v60  ;;  %v3161_v21 = vcombine.low %v3136_v5, %v3144_v9  ;;  %v3162_v31 = vcombine.high %v3136_v5, %v3144_v9 }
 0x7e6   :  { %5301 = vmatmul.mubr.msk.f32.vlgmr.msra.gmra.mxu0 %vm42_vm0, %v2400_v2  ;;  %v2581_v2 = vld [vmem:[%s6435_s4 + $0xe0] sm:$0xff]  ;;  %v3176_v6 = vrot.slane %v3162_v31, %v5707_v15 }
 0x7e7   :  { %5315 = vmatpush3.msra.mxu0 %v2584_v45  ;;  %5322 = vmatprep.mubr.msk.f32.mxu0 %vm42_vm0, %v6011_v29  ;;  %v3069_v29 = vrot.slane %v3061_v24, %v5705_v8  ;;  %v3010_v45 = vcombine.high %v2985_v40, %v3001_v43  ;;  %v3169_v24 = vrot.slane %v3161_v21, %v5707_v15 }
 0x7e8   :  { %5316 = vmatprep.subr.mxu0 %v2583_v13 }
 0x7e9   :  { %5317 = vmatpush3.msra.mxu0 %v2583_v13  ;;  %v3077_v39 = vcombine.low %v3053_v33, %v3069_v29  ;;  %v3078_v38 = vcombine.high %v3053_v33, %v3069_v29  ;;  %v3024_v52 = vrot.slane %v3010_v45, %v5707_v15 }
 0x7ea   :  { %5318 = vmatprep.subr.mxu0 %v2582_v16 }
 0x7eb   :  { %5319 = vmatpush3.msra.mxu0 %v2582_v16  ;;  %v3085_v56 = vrot.slane %v3077_v39, %v5707_v15  ;;  %v3092_v7 = vrot.slane %v3078_v38, %v5707_v15  ;;  %v3113_v62 = vcombine.low %v3017_v51, %v3024_v52  ;;  %v4994_v0 = vcombine.high %v3017_v51, %v3024_v52  ;;  %v4981_v38 = vld [vmem:[%s6435_s4 + $0x120] ss:$0 sm:$0xff] }
 0x7ec   :  { %5320 = vmatprep.subr.mxu0 %v2581_v2  ;;  %v3237_v16 = vrot.slane %v3229_v11, %v5707_v15 }
 0x7ed   :  { %v3181_v49 = vcombine.low %v3085_v56, %v3092_v7  ;;  %v4996_v50 = vcombine.high %v3085_v56, %v3092_v7  ;;  %v3120_v63 = vrot.slane %v3113_v62, %v5705_v8  ;;  %v3128_v4 = vrot.slane %v4994_v0, %v5705_v8  ;;  %5321 = vmatpush3.msra.mxu0 %v2581_v2 }
 0x7ee   :  { %5323 = vmatmul.mubr.msk.f32.vlgmr.msra.gmra.mxu0 %vm42_vm0, %v6024_v32 }
 0x7ef   :  { %v3188_v57 = vrot.slane %v3181_v49, %v5705_v8  ;;  %v3196_v58 = vrot.slane %v4996_v50, %v5705_v8  ;;  %v3145_v61 = vcombine.low %v3120_v63, %v3128_v4  ;;  %v3146_v30 = vcombine.high %v3120_v63, %v3128_v4 }
 0x7f1   :  { %v3213_v10 = vcombine.low %v3188_v57, %v3196_v58  ;;  %v3153_v22 = vrot.slane %v3145_v61, %v5707_v15  ;;  %v3214_v25 = vcombine.high %v3188_v57, %v3196_v58  ;;  %v3160_v36 = vrot.slane %v3146_v30, %v5707_v15 }
 0x7f3   :  { %v3221_v13 = vrot.slane %v3213_v10, %v5707_v15  ;;  %v3177_v33 = vcombine.low %v3153_v22, %v3169_v24  ;;  %v3178_v32 = vcombine.high %v3153_v22, %v3169_v24  ;;  %v3228_v29 = vrot.slane %v3214_v25, %v5707_v15 }
 0x7f4   :  { %v6134_v37 = vcombine.low %v3160_v36, %v3176_v6  ;;  %v6136_v39 = vcombine.high %v3160_v36, %v3176_v6 }
 0x7f5   :  { %v3245_v17 = vcombine.low %v3221_v13, %v3237_v16  ;;  %v3246_v18 = vcombine.high %v3221_v13, %v3237_v16  ;;  %v6130_v12 = vcombine.low %v3228_v29, %v3244_v34  ;;  %v6132_v14 = vcombine.high %v3228_v29, %v3244_v34 }
 0x7f7   :  { %5325 = vmatprep.subr.msk.mxu1 %vm1224_vm5, %v3245_v17  ;;  %5332 = vmatprep.subr.msk.mxu0 %vm1224_vm5, %v3246_v18 }
 0x7f8   :  { %5326 = vmatpush3.xpose.msk.msra.mxu1 %vm1224_vm5, %v3245_v17  ;;  %5333 = vmatpush3.xpose.msk.msra.mxu0 %vm1224_vm5, %v3246_v18 }
 0x7f9   :  { %5327 = vmatprep.subr.msk.mxu1 %vm1224_vm5, %v3177_v33  ;;  %5334 = vmatprep.subr.msk.mxu0 %vm1224_vm5, %v3178_v32 }
 0x7fc   :  { %5328 = vmatpush3.xpose.msk.msra.mxu1 %vm1224_vm5, %v3177_v33  ;;  %5335 = vmatpush3.xpose.msk.msra.mxu0 %vm1224_vm5, %v3178_v32 }
 0x7fd   :  { %5339 = vmatprep.subr.msk.mxu1 %vm1224_vm5, %v6130_v12  ;;  %5346 = vmatprep.subr.msk.mxu0 %vm1224_vm5, %v6132_v14 }
 0x8a6   :  { %v5302_v43 = vpop.f32.mrf.mxu0 }
 0x8a7   :  { %v2488_v40 = vadd.f32 %v5302_v43, %v4981_v38 }
 0x8a8   :  { %v2482_v35 = vpop.f32.mrf.mxu0 }
 0x8a9   :  { %v2483_v41 = vadd.f32 %v4981_v38, %v2482_v35  ;;  %2669 = vrot.lane.b32.xlu1 %v2488_v40, %s5570_s29 }
 0x8ab   :  { %2667 = vrot.lane.b32.xlu0 %v2483_v41, %s5570_s29 }
 0x8ad   :  { %2673 = vrot.lane.b32.xlu1 %v2483_v41, %s5569_s28 }
 0x8ae   :  { %v5324_v27 = vpop.f32.mrf.mxu0 }
 0x8af   :  { %2679 = vrot.lane.b32.xlu0 %v2483_v41, %s5571_s7  ;;  %v6157_v56 = vadd.f32 %v5324_v27, %v6154_v26 }
 0x8b1   :  { %2681 = vrot.lane.b32.xlu1 %v2488_v40, %s5571_s7 }
 0x8b3   :  { %2675 = vrot.lane.b32.xlu0 %v2488_v40, %s5569_s28 }
 0x8b5   :  { %3253 = vrot.lane.b32.xlu1 %v6157_v56, %s5570_s29 }
 0x91b   :  { %v2670_v7 = vpop.permute.xlu1 %2669 }
 0x91d   :  { %v2668_v42 = vpop.permute.xlu0 %2667 }
 0x91f   :  { %v2674_v45 = vpop.permute.xlu1 %2673 }
 0x920   :  { %v2685_v44 = vcombine.low %v2483_v41, %v2674_v45  ;;  %v2686_v47 = vcombine.high %v2483_v41, %v2674_v45 }
 0x921   :  { %v2680_v48 = vpop.permute.xlu0 %2679 }
 0x922   :  { %v2701_v20 = vcombine.low %v2668_v42, %v2680_v48  ;;  %v2702_v49 = vcombine.high %v2668_v42, %v2680_v48  ;;  %v2693_v51 = vrot.slane %v2685_v44, %v5705_v8  ;;  %v2700_v52 = vrot.slane %v2686_v47, %v5705_v8 }
 0x923   :  { %v2682_v50 = vpop.permute.xlu1 %2681 }
 0x924   :  { %v2709_v53 = vrot.slane %v2701_v20, %v5705_v8  ;;  %v2716_v54 = vrot.slane %v2702_v49, %v5705_v8  ;;  %v2769_v46 = vcombine.low %v2670_v7, %v2682_v50  ;;  %v2770_v55 = vcombine.high %v2670_v7, %v2682_v50 }
 0x925   :  { %v2676_v57 = vpop.permute.xlu0 %2675 }
 0x926   :  { %v2717_v58 = vcombine.low %v2693_v51, %v2709_v53  ;;  %v2718_v62 = vcombine.high %v2693_v51, %v2709_v53  ;;  %v2733_v0 = vcombine.low %v2700_v52, %v2716_v54  ;;  %v2734_v1 = vcombine.high %v2700_v52, %v2716_v54 }
 0x927   :  { %v2753_v60 = vcombine.low %v2488_v40, %v2676_v57  ;;  %v2754_v3 = vcombine.high %v2488_v40, %v2676_v57  ;;  %v2777_v9 = vrot.slane %v2769_v46, %v5705_v8  ;;  %v2784_v10 = vrot.slane %v2770_v55, %v5705_v8 }
 0x928   :  { %v2725_v59 = vrot.slane %v2717_v58, %v5707_v15  ;;  %v2732_v63 = vrot.slane %v2718_v62, %v5707_v15  ;;  %v2741_v4 = vrot.slane %v2733_v0, %v5707_v15  ;;  %v2748_v5 = vrot.slane %v2734_v1, %v5707_v15 }
 0x929   :  { %v2761_v11 = vrot.slane %v2753_v60, %v5705_v8  ;;  %v2768_v2 = vrot.slane %v2754_v3, %v5705_v8 }
 0x92a   :  { %v2821_v13 = vcombine.low %v2725_v59, %v2732_v63  ;;  %v4990_v16 = vcombine.high %v2725_v59, %v2732_v63  ;;  %v2837_v17 = vcombine.low %v2741_v4, %v2748_v5  ;;  %v4991_v18 = vcombine.high %v2741_v4, %v2748_v5  ;;  %v6213_v59 = vpop.f32.mrf.mxu0 }
 0x92b   :  { %v2785_v61 = vcombine.low %v2761_v11, %v2777_v9  ;;  %v2786_v21 = vcombine.high %v2761_v11, %v2777_v9  ;;  %v2801_v22 = vcombine.low %v2768_v2, %v2784_v10  ;;  %v2802_v24 = vcombine.high %v2768_v2, %v2784_v10 }
 0x92c   :  { %v2828_v25 = vrot.slane %v2821_v13, %v5705_v8  ;;  %v2836_v28 = vrot.slane %v4990_v16, %v5705_v8  ;;  %v2844_v30 = vrot.slane %v2837_v17, %v5705_v8  ;;  %v2852_v31 = vrot.slane %v4991_v18, %v5705_v8 }
 0x92d   :  { %v2793_v33 = vrot.slane %v2785_v61, %v5707_v15  ;;  %v2800_v32 = vrot.slane %v2786_v21, %v5707_v15  ;;  %v2809_v29 = vrot.slane %v2801_v22, %v5707_v15  ;;  %v2816_v34 = vrot.slane %v2802_v24, %v5707_v15  ;;  %v5531_v61 = vld [vmem:[%s6433_s2] sm:$0xff] }
 0x92e   :  { %v2853_v36 = vcombine.low %v2828_v25, %v2836_v28  ;;  %v2869_v6 = vcombine.low %v2844_v30, %v2852_v31  ;;  %v2854_v7 = vcombine.high %v2828_v25, %v2836_v28  ;;  %v2870_v42 = vcombine.high %v2844_v30, %v2852_v31 }
 0x92f   :  { %v2889_v38 = vcombine.low %v2793_v33, %v2800_v32  ;;  %v4992_v43 = vcombine.high %v2793_v33, %v2800_v32  ;;  %v2905_v40 = vcombine.low %v2809_v29, %v2816_v34  ;;  %v4993_v35 = vcombine.high %v2809_v29, %v2816_v34 }
 0x930   :  { %v2861_v41 = vrot.slane %v2853_v36, %v5707_v15  ;;  %v2877_v27 = vrot.slane %v2869_v6, %v5707_v15  ;;  %v2868_v54 = vrot.slane %v2854_v7, %v5707_v15  ;;  %v2884_v46 = vrot.slane %v2870_v42, %v5707_v15  ;;  %v3254_v42 = vpop.permute.xlu1 %3253 }
 0x931   :  { %v2896_v45 = vrot.slane %v2889_v38, %v5705_v8  ;;  %v2904_v44 = vrot.slane %v4992_v43, %v5705_v8  ;;  %v2912_v47 = vrot.slane %v2905_v40, %v5705_v8  ;;  %v2920_v48 = vrot.slane %v4993_v35, %v5705_v8 }
 0x932   :  { %v2885_v20 = vcombine.low %v2861_v41, %v2877_v27  ;;  %v2886_v49 = vcombine.high %v2861_v41, %v2877_v27  ;;  %v2887_v0 = vcombine.low %v2868_v54, %v2884_v46  ;;  %v2888_v1 = vcombine.high %v2868_v54, %v2884_v46 }
 0x933   :  { %v2921_v50 = vcombine.low %v2896_v45, %v2904_v44  ;;  %v2937_v51 = vcombine.low %v2912_v47, %v2920_v48  ;;  %v2922_v55 = vcombine.high %v2896_v45, %v2904_v44  ;;  %v2938_v57 = vcombine.high %v2912_v47, %v2920_v48 }
 0x934   :  { %5329 = vmatprep.mubr.msk.f32.mxu1 %vm1224_vm5, %v2885_v20  ;;  %5336 = vmatprep.mubr.msk.f32.mxu0 %vm1224_vm5, %v2886_v49 }
 0x935   :  { %v2929_v52 = vrot.slane %v2921_v50, %v5707_v15  ;;  %v2945_v53 = vrot.slane %v2937_v51, %v5707_v15  ;;  %v2936_v60 = vrot.slane %v2922_v55, %v5707_v15  ;;  %v2952_v3 = vrot.slane %v2938_v57, %v5707_v15 }
 0x937   :  { %v2953_v58 = vcombine.low %v2929_v52, %v2945_v53  ;;  %v2954_v62 = vcombine.high %v2929_v52, %v2945_v53 }
 0x939   :  { %5330 = vmatmul.mubr.msk.f32.vlgmr.msra.gmra.mxu1 %vm1224_vm5, %v2953_v58  ;;  %5337 = vmatmul.mubr.msk.f32.vlgmr.msra.gmra.mxu0 %vm1224_vm5, %v2954_v62 }
 0x93a   :  { %5340 = vmatpush3.xpose.msk.msra.mxu1 %vm1224_vm5, %v6130_v12  ;;  %5347 = vmatpush3.xpose.msk.msra.mxu0 %vm1224_vm5, %v6132_v14  ;;  %v2955_v12 = vcombine.low %v2936_v60, %v2952_v3  ;;  %v2956_v14 = vcombine.high %v2936_v60, %v2952_v3 }
 0x93b   :  { %5341 = vmatprep.subr.msk.mxu1 %vm1224_vm5, %v6134_v37  ;;  %5343 = vmatprep.mubr.msk.f32.mxu1 %vm1224_vm5, %v2887_v0 }
 0x93c   :  { %5348 = vmatprep.subr.msk.mxu0 %vm1224_vm5, %v6136_v39  ;;  %5350 = vmatprep.mubr.msk.f32.mxu0 %vm1224_vm5, %v2888_v1 }
 0x93e   :  { %5342 = vmatpush3.xpose.msk.msra.mxu1 %vm1224_vm5, %v6134_v37  ;;  %5349 = vmatpush3.xpose.msk.msra.mxu0 %vm1224_vm5, %v6136_v39  ;;  %v5530_v37 = vld [vmem:[%s6433_s2 + $0x8] sm:$0xff] }
 0x941   :  { %5344 = vmatmul.mubr.msk.f32.vlgmr.msra.gmra.mxu1 %vm1224_vm5, %v2955_v12  ;;  %5351 = vmatmul.mubr.msk.f32.vlgmr.msra.gmra.mxu0 %vm1224_vm5, %v2956_v14 }
 0x9f9   :  { %v5331_v63 = vpop.f32.mrf.mxu1  ;;  %v5338_v4 = vpop.f32.mrf.mxu0 }
 0x9fa   :  { %v3890_v5 = vmul.f32 0.35355338, %v5331_v63  ;;  %v3892_v9 = vmul.f32 0.35355338, %v5338_v4 }
 0x9fb   :  { %v3619_v10 = vpop.f32.mrf.mxu1  ;;  %v3706_v11 = vpop.f32.mrf.mxu0 }
 0x9fc   :  { %v3889_v2 = vmul.f32 0.35355338, %v3619_v10  ;;  %v3900_v39 = vadd.f32 %v5530_v37, %v3892_v9  ;;  %v3898_v13 = vadd.f32 %v5530_v37, %v3890_v5  ;;  %v3891_v16 = vmul.f32 0.35355338, %v3706_v11 }
 0x9fe   :  { %v3914_v17 = vsel %vm1589_vm6, %v3900_v39, -inf  ;;  %v3908_v18 = vsel %vm1589_vm6, %v3898_v13, -inf  ;;  %v3897_v21 = vadd.f32 %v5531_v61, %v3889_v2  ;;  %v3899_v25 = vadd.f32 %v5531_v61, %v3891_v16 }
 0x9ff   :  { %3915 = vmax.xlane.f32.xlu0 %v3914_v17  ;;  %3909 = vmax.xlane.f32.xlu1 %v3908_v18 }
 0xa00   :  { %v3905_v31 = vsel %vm1589_vm6, %v3897_v21, -inf  ;;  %v3911_v36 = vsel %vm1589_vm6, %v3899_v25, -inf }
 0xa01   :  { %v5345_v22 = vpop.f32.mrf.mxu1  ;;  %v5352_v24 = vpop.f32.mrf.mxu0 }
 0xa02   :  { %v3894_v28 = vmul.f32 0.35355338, %v5345_v22  ;;  %v3896_v30 = vmul.f32 0.35355338, %v5352_v24 }
 0xa03   :  { %v3793_v33 = vpop.f32.mrf.mxu1  ;;  %v3880_v32 = vpop.f32.mrf.mxu0  ;;  %3906 = vmax.xlane.f32.xlu0 %v3905_v31 }
 0xa04   :  { %v3893_v29 = vmul.f32 0.35355338, %v3793_v33  ;;  %v3902_v34 = vadd.f32 %v5530_v37, %v3894_v28  ;;  %v3895_v6 = vmul.f32 0.35355338, %v3880_v32  ;;  %v6226_v43 = vadd.f32 %v5530_v37, %v3896_v30 }
 0xa06   :  { %v3920_v38 = vsel %vm1589_vm6, %v3902_v34, -inf  ;;  %v3901_v40 = vadd.f32 %v5531_v61, %v3893_v29  ;;  %v3926_v35 = vsel %vm1589_vm6, %v6226_v43, -inf  ;;  %v3903_v27 = vadd.f32 %v5531_v61, %v3895_v6 }
 0xa07   :  { %3921 = vmax.xlane.f32.xlu1 %v3920_v38  ;;  %3912 = vmax.xlane.f32.xlu0 %v3911_v36 }
 0xa08   :  { %v3917_v41 = vsel %vm1589_vm6, %v3901_v40, -inf  ;;  %v3923_v7 = vsel %vm1589_vm6, %v3903_v27, -inf }
 0xa0b   :  { %3927 = vmax.xlane.f32.xlu1 %v3926_v35  ;;  %3918 = vmax.xlane.f32.xlu0 %v3917_v41 }
 0xa0f   :  { %3924 = vmax.xlane.f32.xlu0 %v3923_v7 }
 0xa1c   :  { %3265 = vrot.lane.b32.xlu1 %v6157_v56, %s5571_s7 }
 0xa25   :  { %3259 = vrot.lane.b32.xlu0 %v6157_v56, %s5569_s28 }
 0xa88   :  { %v3916_v45 = vpop.xlane.xlu0 %3915  ;;  %v3910_v44 = vpop.xlane.xlu1 %3909 }
 0xa89   :  { %v3932_v47 = vsub.f32 %v3900_v39, %v3916_v45  ;;  %v3930_v48 = vsub.f32 %v3898_v13, %v3910_v44 }
 0xa8b   :  { %v3939_v20 = vmul.f32 1.442695, %v3930_v48  ;;  %v3943_v49 = vmul.f32 1.442695, %v3932_v47 }
 0xa8c   :  { %v3907_v50 = vpop.xlane.xlu0 %3906 }
 0xa8d   :  { %v3929_v51 = vsub.f32 %v3897_v21, %v3907_v50  ;;  %5488 = vpow2.f32 %v3939_v20 }
 0xa8e   :  { %5490 = vpow2.f32 %v3943_v49 }
 0xa8f   :  { %v3937_v52 = vmul.f32 1.442695, %v3929_v51 }
 0xa90   :  { %v3922_v53 = vpop.xlane.xlu1 %3921  ;;  %v3913_v54 = vpop.xlane.xlu0 %3912 }
 0xa91   :  { %5492 = vpow2.f32 %v3937_v52  ;;  %v3934_v46 = vsub.f32 %v3902_v34, %v3922_v53  ;;  %v3931_v55 = vsub.f32 %v3899_v25, %v3913_v54 }
 0xa93   :  { %v3947_v57 = vmul.f32 1.442695, %v3934_v46  ;;  %v3941_v58 = vmul.f32 1.442695, %v3931_v55 }
 0xa94   :  { %v6236_v62 = vpop.xlane.xlu1 %3927  ;;  %v3919_v0 = vpop.xlane.xlu0 %3918 }
 0xa95   :  { %5494 = vpow2.f32 %v3947_v57  ;;  %v3933_v1 = vsub.f32 %v3901_v40, %v3919_v0 }
 0xa96   :  { %5496 = vpow2.f32 %v3941_v58 }
 0xa97   :  { %v3945_v60 = vmul.f32 1.442695, %v3933_v1 }
 0xa98   :  { %v3266_v3 = vpop.permute.xlu1 %3265  ;;  %v3925_v12 = vpop.xlane.xlu0 %3924 }
 0xa99   :  { %v3935_v14 = vsub.f32 %v3903_v27, %v3925_v12  ;;  %5498 = vpow2.f32 %v3945_v60  ;;  %v3353_v63 = vcombine.low %v3254_v42, %v3266_v3  ;;  %v3354_v5 = vcombine.high %v3254_v42, %v3266_v3 }
 0xa9a   :  { %v6238_v4 = vpop.eup %5488  ;;  %v2657_v60 = vadd.f32 %v6154_v26, %v6213_v59  ;;  %v3936_v3 = vsub.f32 %v6226_v43, %v6236_v62 }
 0xa9b   :  { %v3949_v9 = vmul.f32 1.442695, %v3935_v14  ;;  %v3956_v10 = vsel %vm1589_vm6, %v6238_v4, 0.0  ;;  %v6242_v2 = vpop.eup %5490  ;;  %v3361_v16 = vrot.slane %v3353_v63, %v5705_v8  ;;  %v3368_v17 = vrot.slane %v3354_v5, %v5705_v8 }
 0xa9c   :  { %v3260_v11 = vpop.permute.xlu0 %3259  ;;  %3957 = vadd.xlane.f32.xlu1 %v3956_v10  ;;  %v3962_v22 = vsel %vm1589_vm6, %v6242_v2, 0.0  ;;  %v3951_v12 = vmul.f32 1.442695, %v3936_v3 }
 0xa9d   :  { %5500 = vpow2.f32 %v3949_v9  ;;  %v3337_v37 = vcombine.low %v6157_v56, %v3260_v11  ;;  %v3338_v39 = vcombine.high %v6157_v56, %v3260_v11 }
 0xa9e   :  { %v6246_v13 = vpop.eup %5492  ;;  %5502 = vpow2.f32 %v3951_v12 }
 0xa9f   :  { %v3345_v18 = vrot.slane %v3337_v37, %v5705_v8  ;;  %v3352_v61 = vrot.slane %v3338_v39, %v5705_v8  ;;  %v3953_v21 = vsel %vm1589_vm6, %v6246_v13, 0.0 }
 0xaa0   :  { %3954 = vadd.xlane.f32.xlu0 %v3953_v21  ;;  %3963 = vadd.xlane.f32.xlu1 %v3962_v22 }
 0xaa1   :  { %v3369_v24 = vcombine.low %v3345_v18, %v3361_v16  ;;  %v3370_v25 = vcombine.high %v3345_v18, %v3361_v16  ;;  %v3385_v56 = vcombine.low %v3352_v61, %v3368_v17  ;;  %v3386_v28 = vcombine.high %v3352_v61, %v3368_v17 }
 0xaa2   :  { %v6256_v30 = vpop.eup %5494 }
 0xaa3   :  { %v6258_v31 = vpop.eup %5496  ;;  %v3377_v33 = vrot.slane %v3369_v24, %v5707_v15  ;;  %v3384_v32 = vrot.slane %v3370_v25, %v5707_v15  ;;  %v3393_v29 = vrot.slane %v3385_v56, %v5707_v15  ;;  %v3400_v34 = vrot.slane %v3386_v28, %v5707_v15 }
 0xaa4   :  { %v3968_v36 = vsel %vm1589_vm6, %v6256_v30, 0.0  ;;  %v3959_v6 = vsel %vm1589_vm6, %v6258_v31, 0.0 }
 0xaa5   :  { %v3473_v38 = vcombine.low %v3377_v33, %v3384_v32  ;;  %v5000_v40 = vcombine.high %v3377_v33, %v3384_v32  ;;  %v3489_v35 = vcombine.low %v3393_v29, %v3400_v34  ;;  %v5001_v41 = vcombine.high %v3393_v29, %v3400_v34  ;;  %3969 = vadd.xlane.f32.xlu1 %v3968_v36 }
 0xaa6   :  { %3960 = vadd.xlane.f32.xlu0 %v3959_v6  ;;  %v6268_v27 = vpop.eup %5498 }
 0xaa7   :  { %v3480_v7 = vrot.slane %v3473_v38, %v5705_v8  ;;  %v3488_v42 = vrot.slane %v5000_v40, %v5705_v8  ;;  %v3496_v45 = vrot.slane %v3489_v35, %v5705_v8  ;;  %v3504_v44 = vrot.slane %v5001_v41, %v5705_v8 }
 0xaa8   :  { %v3965_v47 = vsel %vm1589_vm6, %v6268_v27, 0.0 }
 0xaa9   :  { %v3505_v48 = vcombine.low %v3480_v7, %v3488_v42  ;;  %v3521_v20 = vcombine.low %v3496_v45, %v3504_v44  ;;  %v3506_v49 = vcombine.high %v3480_v7, %v3488_v42  ;;  %v3522_v50 = vcombine.high %v3496_v45, %v3504_v44 }
 0xaaa   :  { %v6276_v51 = vpop.eup %5500  ;;  %3966 = vadd.xlane.f32.xlu0 %v3965_v47 }
 0xaab   :  { %v3971_v52 = vsel %vm1589_vm6, %v6276_v51, 0.0  ;;  %v3513_v53 = vrot.slane %v3505_v48, %v5707_v15  ;;  %v3529_v54 = vrot.slane %v3521_v20, %v5707_v15  ;;  %v3520_v46 = vrot.slane %v3506_v49, %v5707_v15  ;;  %v6295_v14 = vpop.eup %5502 }
 0xaac   :  { %v3536_v55 = vrot.slane %v3522_v50, %v5707_v15  ;;  %v3974_v63 = vsel %vm1589_vm6, %v6295_v14, 0.0 }
 0xaad   :  { %v3537_v57 = vcombine.low %v3513_v53, %v3529_v54  ;;  %v6284_v58 = vcombine.high %v3513_v53, %v3529_v54 }
 0xaae   :  { %3972 = vadd.xlane.f32.xlu0 %v3971_v52  ;;  %v3539_v0 = vcombine.low %v3520_v46, %v3536_v55  ;;  %v6286_v1 = vcombine.high %v3520_v46, %v3536_v55 }
 0xaaf   :  { %5353 = vmatprep.subr.mxu1 %v3537_v57 }
 0xab0   :  { %5367 = vmatprep.subr.mxu0 %v3539_v0  ;;  %5354 = vmatpush3.msra.mxu1 %v3537_v57 }
 0xab1   :  { %5368 = vmatpush3.msra.mxu0 %v3539_v0 }
 0xab6   :  { %3257 = vrot.lane.b32.xlu1 %v2657_v60, %s5569_s28 }
 0xaba   :  { %3263 = vrot.lane.b32.xlu1 %v2657_v60, %s5571_s7 }
 0xac4   :  { %3251 = vrot.lane.b32.xlu0 %v2657_v60, %s5570_s29 }
 0xade   :  { %3975 = vadd.xlane.f32.xlu1 %v3974_v63 }
 0xb25   :  { %v3958_v5 = vpop.xlane.xlu1 %3957 }
 0xb29   :  { %v3955_v9 = vpop.xlane.xlu0 %3954  ;;  %v3964_v26 = vpop.xlane.xlu1 %3963 }
 0xb2a   :  { %5504 = vrcp.f32 %v3955_v9 }
 0xb2e   :  { %v3970_v59 = vpop.xlane.xlu1 %3969 }
 0xb2f   :  { %v3961_v10 = vpop.xlane.xlu0 %3960 }
 0xb32   :  { %v3258_v37 = vpop.permute.xlu1 %3257 }
 0xb33   :  { %v3967_v11 = vpop.xlane.xlu0 %3966  ;;  %v3269_v62 = vcombine.low %v2657_v60, %v3258_v37  ;;  %v3270_v17 = vcombine.high %v2657_v60, %v3258_v37 }
 0xb34   :  { %5506 = vrcp.f32 %v3967_v11 }
 0xb35   :  { %5508 = vrcp.f32 %v3958_v5  ;;  %v3277_v24 = vrot.slane %v3269_v62, %v5705_v8  ;;  %v3284_v25 = vrot.slane %v3270_v17, %v5705_v8 }
 0xb36   :  { %v3264_v18 = vpop.permute.xlu1 %3263  ;;  %5510 = vrcp.f32 %v3970_v59 }
 0xb37   :  { %v5505_v39 = vpop.eup %5504  ;;  %v3973_v16 = vpop.xlane.xlu0 %3972  ;;  %5512 = vrcp.f32 %v3961_v10 }
 0xb38   :  { %v3985_v43 = vmul.f32 %v5505_v39, %v6246_v13  ;;  %5514 = vrcp.f32 %v3964_v26 }
 0xb39   :  { %5516 = vrcp.f32 %v3973_v16 }
 0xb3a   :  { %5357 = vmatprep.mubr.msk.f32.mxu1 %vm1589_vm6, %v3985_v43 }
 0xb3b   :  { %v3252_v61 = vpop.permute.xlu0 %3251 }
 0xb3c   :  { %v3285_v21 = vcombine.low %v3252_v61, %v3264_v18  ;;  %v3286_v22 = vcombine.high %v3252_v61, %v3264_v18 }
 0xb3e   :  { %v3293_v56 = vrot.slane %v3285_v21, %v5705_v8  ;;  %v3300_v28 = vrot.slane %v3286_v22, %v5705_v8 }
 0xb40   :  { %v3301_v13 = vcombine.low %v3277_v24, %v3293_v56  ;;  %v3302_v33 = vcombine.high %v3277_v24, %v3293_v56  ;;  %v3317_v32 = vcombine.low %v3284_v25, %v3300_v28  ;;  %v3318_v29 = vcombine.high %v3284_v25, %v3300_v28 }
 0xb41   :  { %v5507_v34 = vpop.eup %5506 }
 0xb42   :  { %v3309_v36 = vrot.slane %v3301_v13, %v5707_v15  ;;  %v3316_v6 = vrot.slane %v3302_v33, %v5707_v15  ;;  %v3325_v38 = vrot.slane %v3317_v32, %v5707_v15  ;;  %v3332_v40 = vrot.slane %v3318_v29, %v5707_v15  ;;  %v5509_v54 = vpop.eup %5508 }
 0xb43   :  { %v3989_v35 = vmul.f32 %v5507_v34, %v6268_v27  ;;  %v5511_v27 = vpop.eup %5510 }
 0xb44   :  { %v3405_v41 = vcombine.low %v3309_v36, %v3316_v6  ;;  %v4998_v7 = vcombine.high %v3309_v36, %v3316_v6  ;;  %v3421_v42 = vcombine.low %v3325_v38, %v3332_v40  ;;  %v4999_v45 = vcombine.high %v3325_v38, %v3332_v40  ;;  %v5513_v60 = vpop.eup %5512 }
 0xb45   :  { %5371 = vmatprep.mubr.msk.f32.mxu0 %vm1589_vm6, %v3989_v35  ;;  %v5515_v63 = vpop.eup %5514  ;;  %v3990_v5 = vmul.f32 %v5511_v27, %v6256_v30  ;;  %v3987_v26 = vmul.f32 %v5513_v60, %v6258_v31 }
 0xb46   :  { %v3412_v44 = vrot.slane %v3405_v41, %v5705_v8  ;;  %v3420_v47 = vrot.slane %v4998_v7, %v5705_v8  ;;  %v3428_v48 = vrot.slane %v3421_v42, %v5705_v8  ;;  %v3436_v20 = vrot.slane %v4999_v45, %v5705_v8  ;;  %v5517_v9 = vpop.eup %5516  ;;  %v5034_v45 = vld [vmem:[%s6435_s4 + $0x138] ss:$0 sm:$0xff] }
 0xb47   :  { %v3986_v8 = vmul.f32 %v5509_v54, %v6238_v4  ;;  %v3988_v4 = vmul.f32 %v5515_v63, %v6242_v2  ;;  %v3991_v30 = vmul.f32 %v5517_v9, %v6276_v51  ;;  %v4317_v2 = vld [vmem:[%s6435_s4 + $0x100] sm:$0xff]  ;;  %v4318_v51 = vld [vmem:[%s6435_s4 + $0x108] sm:$0xff]  ;;  %v4718_v63 = vld [vmem:[%s6435_s4 + $0x150] sm:$0xff] }
 0xb48   :  { %v3437_v49 = vcombine.low %v3412_v44, %v3420_v47  ;;  %v3453_v50 = vcombine.low %v3428_v48, %v3436_v20  ;;  %v3438_v52 = vcombine.high %v3412_v44, %v3420_v47  ;;  %v3454_v53 = vcombine.high %v3428_v48, %v3436_v20  ;;  %v4815_v9 = vld [vmem:[%s6435_s4 + $0x1a0] sm:$0xff] }
 0xb4a   :  { %v3445_v46 = vrot.slane %v3437_v49, %v5707_v15  ;;  %v3461_v55 = vrot.slane %v3453_v50, %v5707_v15  ;;  %v3452_v57 = vrot.slane %v3438_v52, %v5707_v15  ;;  %v3468_v0 = vrot.slane %v3454_v53, %v5707_v15 }
 0xb4c   :  { %v3469_v3 = vcombine.low %v3445_v46, %v3461_v55  ;;  %v3471_v12 = vcombine.low %v3452_v57, %v3468_v0  ;;  %v3470_v15 = vcombine.high %v3445_v46, %v3461_v55  ;;  %v3472_v59 = vcombine.high %v3452_v57, %v3468_v0 }
 0xb4e   :  { %5355 = vmatprep.subr.mxu1 %v3469_v3  ;;  %5369 = vmatprep.subr.mxu0 %v3471_v12 }
 0xb4f   :  { %5356 = vmatpush3.msra.mxu1 %v3469_v3  ;;  %5370 = vmatpush3.msra.mxu0 %v3471_v12  ;;  %v4719_v12 = vld [vmem:[%s6435_s4 + $0x158] sm:$0xff] }
 0xb50   :  { %5358 = vmatmul.mubr.msk.f32.vlgmr.msra.gmra.mxu1 %vm1589_vm6, %v3986_v8  ;;  %5360 = vmatprep.subr.mxu1 %v6284_v58  ;;  %v4717_v8 = vld [vmem:[%s6435_s4 + $0x148] sm:$0xff] }
 0xb51   :  { %5372 = vmatmul.mubr.msk.f32.vlgmr.msra.gmra.mxu0 %vm1589_vm6, %v3990_v5  ;;  %5361 = vmatpush3.msra.mxu1 %v6284_v58  ;;  %v4716_v5 = vld [vmem:[%s6435_s4 + $0x140] sm:$0xff] }
 0xb52   :  { %5364 = vmatprep.mubr.msk.f32.mxu1 %vm1589_vm6, %v3987_v26  ;;  %5362 = vmatprep.subr.mxu1 %v3470_v15  ;;  %v4814_v26 = vld [vmem:[%s6435_s4 + $0x198] sm:$0xff] }
 0xb53   :  { %5363 = vmatpush3.msra.mxu1 %v3470_v15  ;;  %5381 = vmatprep.subr.mxu0 %v4317_v2  ;;  %v4813_v15 = vld [vmem:[%s6435_s4 + $0x190] sm:$0xff] }
 0xb54   :  { %5365 = vmatmul.mubr.msk.f32.vlgmr.msra.gmra.mxu1 %vm1589_vm6, %v3988_v4  ;;  %5374 = vmatprep.subr.mxu1 %v6286_v1  ;;  %v4812_v4 = vld [vmem:[%s6435_s4 + $0x188] sm:$0xff] }
 0xb55   :  { %5375 = vmatpush3.msra.mxu1 %v6286_v1  ;;  %5378 = vmatprep.mubr.msk.f32.mxu1 %vm1589_vm6, %v3991_v30  ;;  %v4319_v1 = vld [vmem:[%s6435_s4 + $0x110] sm:$0xff] }
 0xb56   :  { %5376 = vmatprep.subr.mxu1 %v3472_v59  ;;  %5382 = vmatpush3.msra.mxu0 %v4317_v2 }
 0xb57   :  { %5377 = vmatpush3.msra.mxu1 %v3472_v59  ;;  %5391 = vmatprep.subr.mxu0 %v4319_v1 }
 0xb58   :  { %5386 = vmatprep.subr.mxu1 %v4318_v51 }
 0xb67   :  { %v3976_v31 = vpop.xlane.xlu1 %3975 }
 0xb68   :  { %5518 = vrcp.f32 %v3976_v31 }
 0xb75   :  { %v5519_v58 = vpop.eup %5518 }
 0xb76   :  { %v3992_v10 = vmul.f32 %v5519_v58, %v6295_v14  ;;  %v4320_v14 = vld [vmem:[%s6435_s4 + $0x118] sm:$0xff] }
 0xb78   :  { %5379 = vmatmul.mubr.msk.f32.vlgmr.msra.gmra.mxu1 %vm1589_vm6, %v3992_v10 }
 0xb79   :  { %5387 = vmatpush3.msra.mxu1 %v4318_v51 }
 0xb7a   :  { %5396 = vmatprep.subr.mxu1 %v4320_v14 }
 0xc10   :  { %v5359_v11 = vpop.f32.mrf.mxu1 }
 0xc11   :  { %v5373_v37 = vpop.f32.mrf.mxu0 }
 0xc12   :  { %v4065_v39 = vpop.f32.mrf.mxu1 }
 0xc13   :  { %5383 = vmatprep.mubr.msk.f32.mxu0 %vm1224_vm5, %v4065_v39  ;;  %v4227_v16 = vpop.f32.mrf.mxu0 }
 0xc14   :  { %v5366_v43 = vpop.f32.mrf.mxu1  ;;  %5384 = vmatmul.mubr.msk.f32.vlgmr.msra.gmra.mxu0 %vm1224_vm5, %v5359_v11 }
 0xc15   :  { %5393 = vmatprep.mubr.msk.f32.mxu0 %vm1224_vm5, %v4227_v16  ;;  %5392 = vmatpush3.msra.mxu0 %v4319_v1 }
 0xc16   :  { %v4146_v62 = vpop.f32.mrf.mxu1  ;;  %5401 = vmatprep.subr.mxu0 %v4719_v12 }
 0xc17   :  { %5388 = vmatprep.mubr.msk.f32.mxu1 %vm1224_vm5, %v4146_v62 }
 0xc18   :  { %5389 = vmatmul.mubr.msk.f32.vlgmr.msra.gmra.mxu1 %vm1224_vm5, %v5366_v43  ;;  %5394 = vmatmul.mubr.msk.f32.vlgmr.msra.gmra.mxu0 %vm1224_vm5, %v5373_v37 }
 0xc19   :  { %5397 = vmatpush3.msra.mxu1 %v4320_v14  ;;  %5402 = vmatpush3.msra.mxu0 %v4719_v12 }
 0xc1a   :  { %5403 = vmatprep.subr.mxu0 %v4718_v63  ;;  %5412 = vmatprep.subr.mxu1 %v4815_v9 }
 0xc1b   :  { %5404 = vmatpush3.msra.mxu0 %v4718_v63 }
 0xc1c   :  { %5405 = vmatprep.subr.mxu0 %v4717_v8 }
 0xc1d   :  { %5406 = vmatpush3.msra.mxu0 %v4717_v8 }
 0xc1e   :  { %5407 = vmatprep.subr.mxu0 %v4716_v5 }
 0xc1f   :  { %5408 = vmatpush3.msra.mxu0 %v4716_v5 }
 0xc38   :  { %v5380_v17 = vpop.f32.mrf.mxu1 }
 0xc3a   :  { %v4308_v18 = vpop.f32.mrf.mxu1 }
 0xc3b   :  { %5398 = vmatprep.mubr.msk.f32.mxu1 %vm1224_vm5, %v4308_v18  ;;  %v4708_v18 = vstv %s5035_s1 }
 0xc3c   :  { %5399 = vmatmul.mubr.msk.f32.vlgmr.msra.gmra.mxu1 %vm1224_vm5, %v5380_v17 }
 0xc3d   :  { %5413 = vmatpush3.msra.mxu1 %v4815_v9 }
 0xc3e   :  { %5414 = vmatprep.subr.mxu1 %v4814_v26 }
 0xc3f   :  { %5415 = vmatpush3.msra.mxu1 %v4814_v26 }
 0xc40   :  { %5416 = vmatprep.subr.mxu1 %v4813_v15 }
 0xc41   :  { %5417 = vmatpush3.msra.mxu1 %v4813_v15 }
 0xc42   :  { %5418 = vmatprep.subr.mxu1 %v4812_v4 }
 0xc43   :  { %5419 = vmatpush3.msra.mxu1 %v4812_v4 }
 0xcd4   :  { %v5385_v61 = vpop.f32.mrf.mxu0 }
 0xcd5   :  { %v4652_v28 = vsel %vm42_vm0, %v5385_v61, 0.0 }
 0xcd6   :  { %v4393_v22 = vpop.f32.mrf.mxu0 }
 0xcd7   :  { %v4645_v32 = vsel %vm42_vm0, %v4393_v22, 0.0  ;;  %v4713_v22 = vstv %s5036_s16 }
 0xcd8   :  { %v5390_v21 = vpop.f32.mrf.mxu1  ;;  %v5395_v56 = vpop.f32.mrf.mxu0 }
 0xcd9   :  { %v4653_v25 = vsel %vm42_vm0, %v5390_v21, 0.0  ;;  %v4655_v36 = vsel %vm42_vm0, %v5395_v56, 0.0 }
 0xcda   :  { %v4474_v24 = vpop.f32.mrf.mxu1  ;;  %v4654_v33 = vadd.f32 %v4653_v25, %v4652_v28  ;;  %v4555_v34 = vpop.f32.mrf.mxu0 }
 0xcdb   :  { %v4646_v13 = vsel %vm42_vm0, %v4474_v24, 0.0  ;;  %v4648_v40 = vsel %vm42_vm0, %v4555_v34, 0.0  ;;  %v4809_v34 = vld [vmem:[%s6435_s4 + $0x170] sm:$0xff] }
 0xcdc   :  { %v4647_v29 = vadd.f32 %v4646_v13, %v4645_v32  ;;  %v4656_v6 = vadd.f32 %v4655_v36, %v4654_v33  ;;  %v4811_v32 = vld [vmem:[%s6435_s4 + $0x180] sm:$0xff]  ;;  %v4808_v36 = vld [vmem:[%s6435_s4 + $0x168] sm:$0xff] }
 0xcdd   :  { %5420 = vmatprep.subr.mxu1 %v4811_v32 }
 0xcde   :  { %v4649_v41 = vadd.f32 %v4648_v40, %v4647_v29  ;;  %5421 = vmatpush3.msra.mxu1 %v4811_v32  ;;  %v4810_v29 = vld [vmem:[%s6435_s4 + $0x178] sm:$0xff] }
 0xcdf   :  { %5422 = vmatprep.subr.mxu1 %v4810_v29 }
 0xce0   :  { %5423 = vmatpush3.msra.mxu1 %v4810_v29 }
 0xce1   :  { %5424 = vmatprep.subr.mxu1 %v4809_v34 }
 0xce2   :  { %5425 = vmatpush3.msra.mxu1 %v4809_v34 }
 0xce3   :  { %5426 = vmatprep.subr.mxu1 %v4808_v36 }
 0xce4   :  { %5427 = vmatpush3.msra.mxu1 %v4808_v36 }
 0xcfc   :  { %v5400_v38 = vpop.f32.mrf.mxu1 }
 0xcfd   :  { %v4657_v35 = vsel %vm42_vm0, %v5400_v38, 0.0 }
 0xcfe   :  { %v4658_v7 = vadd.f32 %v4657_v35, %v4656_v6  ;;  %v4636_v42 = vpop.f32.mrf.mxu1  ;;  %v5037_v6 = vld [vmem:[%s6435_s4 + $0x160] ss:$0 sm:$0xff] }
 0xcff   :  { %v4650_v44 = vsel %vm42_vm0, %v4636_v42, 0.0 }
 0xd00   :  { %v4651_v47 = vadd.f32 %v4650_v44, %v4649_v41  ;;  %v4665_v48 = vadd.f32 %v5034_v45, %v4658_v7 }
 0xd02   :  { %v4664_v20 = vadd.f32 %v5034_v45, %v4651_v47  ;;  %v6372_v52 = vadd.f32 %v4665_v48, %v5991_v19  ;;  %v5040_v45 = vld [vmem:[%s6435_s4 + $0x1a8] ss:$0 sm:$0xff] }
 0xd04   :  { %v6367_v49 = vadd.f32 %v4664_v20, %v5998_v23  ;;  %v4673_v53 = vsel %vm42_vm0, %v6372_v52, 0.0 }
 0xd06   :  { %v4670_v50 = vsel %vm42_vm0, %v6367_v49, 0.0 }
 0xd07   :  { %4671 = vadd.xlane.f32.xlu0 %v4670_v50 }
 0xd0b   :  { %4674 = vadd.xlane.f32.xlu0 %v4673_v53 }
 0xd90   :  { %v4672_v54 = vpop.xlane.xlu0 %4671 }
 0xd91   :  { %v4676_v27 = vmul.f32 0.03125, %v4672_v54 }
 0xd93   :  { %v4678_v46 = vsub.f32 %v6367_v49, %v4676_v27 }
 0xd94   :  { %v4675_v55 = vpop.xlane.xlu0 %4674 }
 0xd95   :  { %v4677_v57 = vmul.f32 0.03125, %v4675_v55  ;;  %v4680_v0 = vmul.f32 %v4678_v46, %v4678_v46  ;;  %v4709_v61 = vmul.f32 %v4708_v18, %v4678_v46 }
 0xd97   :  { %v4679_v23 = vsub.f32 %v6372_v52, %v4677_v57  ;;  %v4682_v60 = vsel %vm42_vm0, %v4680_v0, 0.0 }
 0xd98   :  { %4683 = vadd.xlane.f32.xlu0 %v4682_v60 }
 0xd99   :  { %v4681_v3 = vmul.f32 %v4679_v23, %v4679_v23  ;;  %v4710_v25 = vmul.f32 %v4708_v18, %v4679_v23 }
 0xd9b   :  { %v4685_v19 = vsel %vm42_vm0, %v4681_v3, 0.0 }
 0xd9c   :  { %4686 = vadd.xlane.f32.xlu1 %v4685_v19 }
 0xe21   :  { %v4684_v30 = vpop.xlane.xlu0 %4683 }
 0xe22   :  { %v4688_v59 = vmul.f32 0.032258064, %v4684_v30 }
 0xe24   :  { %5520 = vrsqrt.f32 %v4688_v59  ;;  %vm4692_vm11 = vcmp.eq.f32.partialorder %v4688_v59, inf  ;;  %v4695_v51 = vand.u32 2147483648, %v4688_v59  ;;  %vm4694_vm12 = vcmp.eq.f32.partialorder %v4688_v59, 0.0 }
 0xe25   :  { %v4687_v31 = vpop.xlane.xlu1 %4686 }
 0xe26   :  { %v4689_v58 = vmul.f32 0.032258064, %v4687_v31 }
 0xe28   :  { %5522 = vrsqrt.f32 %v4689_v58  ;;  %vm4699_vm13 = vcmp.eq.f32.partialorder %v4689_v58, inf  ;;  %v4702_v16 = vand.u32 2147483648, %v4689_v58  ;;  %vm4701_vm14 = vcmp.eq.f32.partialorder %v4689_v58, 0.0 }
 0xe31   :  { %v5521_v10 = vpop.eup %5520 }
 0xe32   :  { %v4691_v2 = vmul.f32 %v5521_v10, %v4688_v59 }
 0xe34   :  { %v4693_v1 = vsel %vm4692_vm11, %v4688_v59, %v4691_v2 }
 0xe35   :  { %v5523_v14 = vpop.eup %5522  ;;  %v4696_v11 = vsel %vm4694_vm12, %v4695_v51, %v4693_v1 }
 0xe36   :  { %v4704_v37 = vadd.f32 32.0, %v4696_v11  ;;  %v4698_v39 = vmul.f32 %v5523_v14, %v4689_v58 }
 0xe38   :  { %5524 = vrcp.f32 %v4704_v37  ;;  %v4700_v43 = vsel %vm4699_vm13, %v4689_v58, %v4698_v39 }
 0xe39   :  { %v4703_v62 = vsel %vm4701_vm14, %v4702_v16, %v4700_v43 }
 0xe3a   :  { %v4705_v17 = vadd.f32 32.0, %v4703_v62 }
 0xe3c   :  { %5526 = vrcp.f32 %v4705_v17 }
 0xe45   :  { %v5525_v21 = vpop.eup %5524 }
 0xe46   :  { %v4711_v24 = vmul.f32 %v5525_v21, %v4709_v61 }
 0xe48   :  { %v4714_v56 = vadd.f32 %v4713_v22, %v4711_v24 }
 0xe49   :  { %v5527_v28 = vpop.eup %5526 }
 0xe4a   :  { %v4712_v13 = vmul.f32 %v5527_v28, %v4710_v25  ;;  %5409 = vmatprep.mubr.msk.f32.mxu0 %vm42_vm0, %v4714_v56 }
 0xe4c   :  { %v4715_v33 = vadd.f32 %v4713_v22, %v4712_v13 }
 0xe4e   :  { %5410 = vmatmul.mubr.msk.f32.vlgmr.msra.gmra.mxu0 %vm42_vm0, %v4715_v33 }
 0xf0e   :  { %v5411_v38 = vpop.f32.mrf.mxu0 }
 0xf0f   :  { %v4803_v40 = vadd.f32 %v5411_v38, %v5037_v6 }
 0xf10   :  { %v4797_v35 = vpop.f32.mrf.mxu0 }
 0xf11   :  { %v4798_v41 = vadd.f32 %v5037_v6, %v4797_v35  ;;  %v4807_v42 = vmax.f32 %v4803_v40, 0.0 }
 0xf13   :  { %v4806_v7 = vmax.f32 %v4798_v41, 0.0 }
 0xf15   :  { %5428 = vmatprep.mubr.msk.f32.mxu1 %vm4821_vm15, %v4806_v7 }
 0xf16   :  { %5429 = vmatmul.mubr.msk.f32.vlgmr.msra.gmra.mxu1 %vm4821_vm15, %v4807_v42 }
 0xfd6   :  { %v5430_v44 = vpop.f32.mrf.mxu1 }
 0xfd7   :  { %v4900_v47 = vadd.f32 %v5430_v44, %v5040_v45 }
 0xfd8   :  { %v4894_v48 = vpop.f32.mrf.mxu1 }
 0xfd9   :  { %v4904_v20 = vadd.f32 %v4900_v47, %v6372_v52  ;;  %v4895_v50 = vadd.f32 %v5040_v45, %v4894_v48 }
 0xfdb   :  { %4906 = vst.msk [vmem:[#allocation5 + $0x8] sm:$0xff] %vm42_vm0, %v4904_v20  ;;  %v4903_v53 = vadd.f32 %v4895_v50, %v6367_v49 }
 0xfdd   :  { %4905 = vst.msk [vmem:[#allocation5] sm:$0xff] %vm42_vm0, %v4903_v53 }
 0xfde   :  { %5555 = shalt.err (!%p5552_p9)
}
 0xfdf   :  { %s5575_s4 = smov 128   ;;  %s5576_s27 = smov 8  }
 0xfe0   :  { %4918 = dma.vmem_to_hbm [thread:$0]  %s4913_s3, 256, %s6436_s5, [#allocation3], %s5575_s4, %s5575_s4, %s5576_s27  }
 0xfe1   :  { %5566 = dma.done.wait [#allocation3], 256  }
 0xfe2   :  { %5567 = vsyncadd [#allocation3], 4294967040 }
 0xfe3   :  { %4922 = vsyncpa [#allocation3], 1 }
 0xfe4   :  { %4923 = vsyncpa [#allocation4], 1 }

</bundles_post_ra>
